<compile_context>
chip_gen: v6e
topology: v6e:2x2x1
jax: 0.10.0
libtpu: 0.0.40
codegen_flags: <defaults>
</compile_context>

<pallas_src>
import functools

import jax
import jax.numpy as jnp
from jax import lax
from jax.experimental import pallas as pl
from jax.experimental.pallas import tpu as pltpu


def _attn_head_kernel(x_ref, wp_ref, bp_ref, wo_ref, bo_ref, o_ref, acc_ref,
                      *, d_k, mxu_dtype, approx_recip):
    """One (batch, head) grid step, channels-as-sublane layout.

    x_ref  : (1, C, S)   input tokens, channels in sublanes, tokens in lanes
    wp_ref : (3D, C)     this head's slice of projection.weight (q-rows pre-scaled)
    bp_ref : (3D, 1)     this head's slice of projection.bias   (q-rows pre-scaled)
    wo_ref : (D, C)      this head's slice of output.weight (transposed once)
    bo_ref : (C, 1)      output.bias
    o_ref  : (1, C, S)   output tokens (same block across the head axis)
    acc_ref: (C, S) f32  resident accumulator scratch
    """
    h = pl.program_id(1)
    n_h = pl.num_programs(1)

    x = x_ref[0]                                       # (C, S), f32

    # Init accumulator exactly once per batch element: residual + output bias.
    @pl.when(h == 0)
    def _():
        acc_ref[...] = x + bo_ref[...]                 # (C,S) + (C,1)

    xm = x.astype(mxu_dtype)

    # qkv projection for this head: (3D, C) @ (C, S) -> (3D, S), f32 accum.
    # The 1/sqrt(d_k) scale is already baked into the q rows of wp/bp.
    qkv = jnp.dot(wp_ref[...].astype(mxu_dtype), xm,
                  preferred_element_type=jnp.float32) + bp_ref[...]

    q = qkv[0 * d_k:1 * d_k, :]                        # (D, S), pre-scaled
    k = qkv[1 * d_k:2 * d_k, :]
    v = qkv[2 * d_k:3 * d_k, :]

    # attn[i, j] = sum_d q[d, i] * k[d, j]     (einsum 'bihd,bjhd->bijh')
    attn = lax.dot_general(q.astype(mxu_dtype), k.astype(mxu_dtype),
                           (((0,), (0,)), ((), ())),
                           preferred_element_type=jnp.float32)     # (S_i, S_j)

    # softmax over dim=1 of (b,i,j,h) == the query axis i == axis 0 here.
    # Kept in f32 (cheap; v5e has no bf16 VPU/EUP path).
    attn = attn - jnp.max(attn, axis=0, keepdims=True)
    attn = jnp.exp(attn)
    attn = attn * pl.reciprocal(jnp.sum(attn, axis=0, keepdims=True),
                                approx=approx_recip)

    # res_t[d, i] = sum_j v[d, j] * attn[i, j]   ('bijh,bjhd->bihd')  -> (D, S)
    res_t = lax.dot_general(v.astype(mxu_dtype), attn.astype(mxu_dtype),
                            (((1,), (1,)), ((), ())),
                            preferred_element_type=jnp.float32)

    # Per-head output projection, accumulated (no concat, no (S,H*D) buffer):
    # out[c, s] += sum_d wo_t[d, c] * res_t[d, s]
    acc_ref[...] += lax.dot_general(wo_ref[...].astype(mxu_dtype),
                                    res_t.astype(mxu_dtype),
                                    (((0,), (0,)), ((), ())),
                                    preferred_element_type=jnp.float32)

    @pl.when(h == n_h - 1)
    def _():
        o_ref[0] = acc_ref[...].astype(o_ref.dtype)


def attention_block_pallas(x_nchw, wp, bp, wo, bo, *, n_heads, d_k,
                           mxu_dtype=jnp.float32):
    """x_nchw: (B, C, H, W) f32.
    wp: (3*n_heads*d_k, C)  = nn.Linear(C, 3HD).weight   (native layout)
    bp: (3*n_heads*d_k,)    = nn.Linear(C, 3HD).bias
    wo: (C, n_heads*d_k)    = nn.Linear(HD, C).weight    (native layout)
    bo: (C,)                = nn.Linear(HD, C).bias
    Returns (B, C, H, W).  d_k must be a multiple of 8 when n_heads > 1."""
    B, C, Hh, Ww = x_nchw.shape
    S = Hh * Ww
    D3 = 3 * d_k
    scale = float(d_k) ** -0.5

    # NCHW -> (B, C, S): pure reshape, NO transpose.  S is the lane axis.
    x = x_nchw.reshape(B, C, S)

    # Tiny one-time weight shaping (no activation-sized work):
    #  * fold 1/sqrt(d_k) into the q rows of wp/bp (exact f32, weight-sized)
    #  * transpose wo once so per-head (D, C) slices are contiguous rows
    wp_s = wp.reshape(n_heads, 3, d_k, C).at[:, 0].multiply(scale)
    wp_s = wp_s.reshape(n_heads * D3, C)
    bp_s = bp.reshape(n_heads, 3, d_k).at[:, 0].multiply(scale)
    bp_col = bp_s.reshape(n_heads * D3, 1)   # broadcast over lanes (tokens)
    wo_t = wo.T                              # (HD, C)
    bo_col = bo.reshape(C, 1)

    kern = functools.partial(
        _attn_head_kernel, d_k=d_k, mxu_dtype=mxu_dtype,
        approx_recip=(mxu_dtype != jnp.float32))

    out = pl.pallas_call(
        kern,
        out_shape=jax.ShapeDtypeStruct((B, C, S), x.dtype),
        grid_spec=pltpu.PrefetchScalarGridSpec(
            num_scalar_prefetch=0,
            grid=(B, n_heads),                       # heads = reduction axis
            in_specs=[
                pl.BlockSpec((1, C, S), lambda b, h: (b, 0, 0)),   # x
                pl.BlockSpec((D3, C),   lambda b, h: (h, 0)),      # wp head slice
                pl.BlockSpec((D3, 1),   lambda b, h: (h, 0)),      # bp head slice
                pl.BlockSpec((d_k, C),  lambda b, h: (h, 0)),      # wo_t head slice
                pl.BlockSpec((C, 1),    lambda b, h: (0, 0)),      # bo
            ],
            out_specs=pl.BlockSpec((1, C, S), lambda b, h: (b, 0, 0)),
            scratch_shapes=[pltpu.VMEM((C, S), jnp.float32)],
        ),
        compiler_params=pltpu.CompilerParams(
            dimension_semantics=("parallel", "arbitrary"),
            vmem_limit_bytes=32 * 1024 * 1024),
    )(x, wp_s, bp_col, wo_t, bo_col)

    # (B, C, S) -> NCHW: pure reshape, NO transpose.
    return out.reshape(B, C, Hh, Ww)


def attention_block_reference(x_nchw, wp, bp, wo, bo, *, n_heads, d_k):
    """Pure-JAX reference matching the PyTorch forward() exactly
    (weights in native nn.Linear layout)."""
    B, C, Hh, Ww = x_nchw.shape
    S = Hh * Ww
    x = jnp.transpose(x_nchw.reshape(B, C, S), (0, 2, 1))          # (B, S, C)
    qkv = (x @ wp.T + bp).reshape(B, S, n_heads, 3 * d_k)
    q, k, v = jnp.split(qkv, 3, axis=-1)
    attn = jnp.einsum('bihd,bjhd->bijh', q, k) * (float(d_k) ** -0.5)
    attn = jax.nn.softmax(attn, axis=1)                            # dim=1 == i
    res = jnp.einsum('bijh,bjhd->bihd', attn, v).reshape(B, S, n_heads * d_k)
    res = res @ wo.T + bo + x
    return jnp.transpose(res, (0, 2, 1)).reshape(B, C, Hh, Ww)


if __name__ == "__main__":
    B, C, H, W = 2, 32, 16, 16      # S = 256 tokens -> lane-dense output

    key_a, key_b = jax.random.split(jax.random.PRNGKey(0))

    def make_params(key, n_heads, d_k):
        kx, kwp, kbp, kwo, kbo = jax.random.split(key, 5)
        HD = n_heads * d_k
        x = jax.random.normal(kx, (B, C, H, W), dtype=jnp.float32)
        wp = 0.05 * jax.random.normal(kwp, (3 * HD, C), dtype=jnp.float32)
        bp = 0.05 * jax.random.normal(kbp, (3 * HD,), dtype=jnp.float32)
        wo = 0.05 * jax.random.normal(kwo, (C, HD), dtype=jnp.float32)
        bo = 0.05 * jax.random.normal(kbo, (C,), dtype=jnp.float32)
        return x, wp, bp, wo, bo

    # Config A: module defaults (n_heads=1, d_k=n_channels), f32 MXU path.
    x, wp, bp, wo, bo = make_params(key_a, 1, C)
    out = jax.block_until_ready(
        attention_block_pallas(x, wp, bp, wo, bo, n_heads=1, d_k=C))
    ref = attention_block_reference(x, wp, bp, wo, bo, n_heads=1, d_k=C)
    assert out.shape == (B, C, H, W)
    assert jnp.allclose(out, ref, atol=2e-4, rtol=2e-4), (
        f"f32 max abs err = {jnp.max(jnp.abs(out - ref))}")

    # Config B: multi-head + bf16 MXU operands (v6e/v7x fast path), f32 accum.
    n_heads, d_k = 4, 8
    x, wp, bp, wo, bo = make_params(key_b, n_heads, d_k)
    out = jax.block_until_ready(
        attention_block_pallas(x, wp, bp, wo, bo, n_heads=n_heads, d_k=d_k,
                               mxu_dtype=jnp.bfloat16))
    ref = attention_block_reference(x, wp, bp, wo, bo, n_heads=n_heads, d_k=d_k)
    assert jnp.allclose(out, ref, atol=5e-2, rtol=5e-2), (
        f"bf16 max abs err = {jnp.max(jnp.abs(out - ref))}")

    print("KERNEL_OK")
</pallas_src>

<mosaic_0001>
module attributes {stable_mosaic.version = 11 : i64} {
  func.func @_attn_head_kernel(%arg0: i32, %arg1: i32, %arg2: memref<1x32x256xf32, #tpu.memory_space<vmem>>, %arg3: memref<96x32xf32, #tpu.memory_space<vmem>>, %arg4: memref<96x1xf32, #tpu.memory_space<vmem>>, %arg5: memref<32x32xf32, #tpu.memory_space<vmem>>, %arg6: memref<32x1xf32, #tpu.memory_space<vmem>>, %arg7: memref<1x32x256xf32, #tpu.memory_space<vmem>>, %arg8: memref<32x256xf32, #tpu.memory_space<vmem>>) attributes {dimension_semantics = [#tpu.dimension_semantics<parallel>, #tpu.dimension_semantics<arbitrary>], iteration_bounds = array<i64: 2, 1>, scalar_prefetch = 0 : i64, scratch_operands = 1 : i64, tpu.core_type = #tpu.core_type<tc>, window_params = [{transform_indices = @transform_0, window_bounds = array<i64: 1, 32, 256>}, {transform_indices = @transform_1, window_bounds = array<i64: 96, 32>}, {transform_indices = @transform_2, window_bounds = array<i64: 96, 1>}, {transform_indices = @transform_3, window_bounds = array<i64: 32, 32>}, {pipeline_mode = #tpu.pipeline_mode<synchronous>, transform_indices = @transform_4, window_bounds = array<i64: 32, 1>}, {transform_indices = @transform_5, window_bounds = array<i64: 1, 32, 256>}]} {
    %c0 = arith.constant 0 : index
    %c0_0 = arith.constant 0 : index
    %c0_1 = arith.constant 0 : index
    %0 = vector.load %arg2[%c0, %c0_0, %c0_1] : memref<1x32x256xf32, #tpu.memory_space<vmem>>, vector<1x32x256xf32>
    %1 = vector.shape_cast %0 : vector<1x32x256xf32> to vector<32x256xf32>
    %c0_i32 = arith.constant 0 : i32
    %2 = arith.cmpi eq, %arg1, %c0_i32 : i32
    %3 = arith.extui %2 : i1 to i32
    %c0_i32_2 = arith.constant 0 : i32
    %4 = arith.cmpi ne, %3, %c0_i32_2 : i32
    scf.if %4 {
      %c0_20 = arith.constant 0 : index
      %c0_21 = arith.constant 0 : index
      %33 = vector.load %arg6[%c0_20, %c0_21] : memref<32x1xf32, #tpu.memory_space<vmem>>, vector<32x1xf32>
      %34 = vector.broadcast %33 : vector<32x1xf32> to vector<32x256xf32>
      %35 = arith.addf %1, %34 : vector<32x256xf32>
      %c0_22 = arith.constant 0 : index
      %c0_23 = arith.constant 0 : index
      %36 = vector.load %arg8[%c0_22, %c0_23] : memref<32x256xf32, #tpu.memory_space<vmem>>, vector<32x256xf32>
      tpu.vector_store %arg8[%c0_22, %c0_23], %35 {strides = array<i32>} : memref<32x256xf32, #tpu.memory_space<vmem>>, vector<32x256xf32>,
    } else {
    }
    %c0_3 = arith.constant 0 : index
    %c0_4 = arith.constant 0 : index
    %5 = vector.load %arg3[%c0_3, %c0_4] : memref<96x32xf32, #tpu.memory_space<vmem>>, vector<96x32xf32>
    %cst = arith.constant dense<0.000000e+00> : vector<96x256xf32>
    %6 = tpu.matmul %5, %1, %cst {dimension_numbers = #tpu.dot_dimension_numbers<[1], [0], [0], [1], [0, 0, 1, 1], [], []>} : vector<96x32xf32>, vector<32x256xf32>, vector<96x256xf32> -> vector<96x256xf32>
    %c0_5 = arith.constant 0 : index
    %c0_6 = arith.constant 0 : index
    %7 = vector.load %arg4[%c0_5, %c0_6] : memref<96x1xf32, #tpu.memory_space<vmem>>, vector<96x1xf32>
    %8 = vector.broadcast %7 : vector<96x1xf32> to vector<96x256xf32>
    %9 = arith.addf %6, %8 : vector<96x256xf32>
    %10 = vector.extract_strided_slice %9 {offsets = [0, 0], sizes = [32, 256], strides = [1, 1]} : vector<96x256xf32> to vector<32x256xf32>
    %11 = vector.extract_strided_slice %9 {offsets = [32, 0], sizes = [32, 256], strides = [1, 1]} : vector<96x256xf32> to vector<32x256xf32>
    %12 = vector.extract_strided_slice %9 {offsets = [64, 0], sizes = [32, 256], strides = [1, 1]} : vector<96x256xf32> to vector<32x256xf32>
    %cst_7 = arith.constant dense<0.000000e+00> : vector<256x256xf32>
    %13 = tpu.matmul %10, %11, %cst_7 {dimension_numbers = #tpu.dot_dimension_numbers<[0], [0], [1], [1], [0, 1, 1, 1], [], []>} : vector<32x256xf32>, vector<32x256xf32>, vector<256x256xf32> -> vector<256x256xf32>
    %cst_8 = arith.constant dense<0xFF800000> : vector<256xf32>
    %14 = vector.multi_reduction <maximumf>, %13, %cst_8 [0] : vector<256x256xf32> to vector<256xf32>
    %15 = vector.shape_cast %14 : vector<256xf32> to vector<1x256xf32>
    %16 = vector.broadcast %15 : vector<1x256xf32> to vector<256x256xf32>
    %17 = arith.subf %13, %16 : vector<256x256xf32>
    %18 = math.exp %17 : vector<256x256xf32>
    %cst_9 = arith.constant dense<0.000000e+00> : vector<256xf32>
    %19 = vector.multi_reduction <add>, %18, %cst_9 [0] : vector<256x256xf32> to vector<256xf32>
    %20 = vector.shape_cast %19 : vector<256xf32> to vector<1x256xf32>
    %21 = tpu.reciprocal %20 : vector<1x256xf32> -> vector<1x256xf32>
    %22 = vector.broadcast %21 : vector<1x256xf32> to vector<256x256xf32>
    %23 = arith.mulf %18, %22 : vector<256x256xf32>
    %cst_10 = arith.constant dense<0.000000e+00> : vector<32x256xf32>
    %24 = tpu.matmul %12, %23, %cst_10 {dimension_numbers = #tpu.dot_dimension_numbers<[1], [1], [0], [0], [0, 0, 1, 0], [], []>} : vector<32x256xf32>, vector<256x256xf32>, vector<32x256xf32> -> vector<32x256xf32>
    %c0_11 = arith.constant 0 : index
    %c0_12 = arith.constant 0 : index
    %25 = vector.load %arg8[%c0_11, %c0_12] : memref<32x256xf32, #tpu.memory_space<vmem>>, vector<32x256xf32>
    %c0_13 = arith.constant 0 : index
    %c0_14 = arith.constant 0 : index
    %26 = vector.load %arg5[%c0_13, %c0_14] : memref<32x32xf32, #tpu.memory_space<vmem>>, vector<32x32xf32>
    %cst_15 = arith.constant dense<0.000000e+00> : vector<32x256xf32>
    %27 = tpu.matmul %26, %24, %cst_15 {dimension_numbers = #tpu.dot_dimension_numbers<[0], [0], [1], [1], [0, 1, 1, 1], [], []>} : vector<32x32xf32>, vector<32x256xf32>, vector<32x256xf32> -> vector<32x256xf32>
    %28 = arith.addf %25, %27 : vector<32x256xf32>
    %c0_16 = arith.constant 0 : index
    %c0_17 = arith.constant 0 : index
    %29 = vector.load %arg8[%c0_16, %c0_17] : memref<32x256xf32, #tpu.memory_space<vmem>>, vector<32x256xf32>
    tpu.vector_store %arg8[%c0_16, %c0_17], %28 {strides = array<i32>} : memref<32x256xf32, #tpu.memory_space<vmem>>, vector<32x256xf32>,
    %c0_i32_18 = arith.constant 0 : i32
    %30 = arith.cmpi eq, %arg1, %c0_i32_18 : i32
    %31 = arith.extui %30 : i1 to i32
    %c0_i32_19 = arith.constant 0 : i32
    %32 = arith.cmpi ne, %31, %c0_i32_19 : i32
    scf.if %32 {
      %c0_20 = arith.constant 0 : index
      %c0_21 = arith.constant 0 : index
      %33 = vector.load %arg8[%c0_20, %c0_21] : memref<32x256xf32, #tpu.memory_space<vmem>>, vector<32x256xf32>
      %c0_22 = arith.constant 0 : index
      %c0_23 = arith.constant 0 : index
      %c0_24 = arith.constant 0 : index
      %34 = vector.load %arg7[%c0_22, %c0_23, %c0_24] : memref<1x32x256xf32, #tpu.memory_space<vmem>>, vector<1x32x256xf32>
      %35 = vector.shape_cast %34 : vector<1x32x256xf32> to vector<32x256xf32>
      %36 = vector.shape_cast %33 : vector<32x256xf32> to vector<1x32x256xf32>
      tpu.vector_store %arg7[%c0_22, %c0_23, %c0_24], %36 {strides = array<i32>} : memref<1x32x256xf32, #tpu.memory_space<vmem>>, vector<1x32x256xf32>,
    } else {
    }
    return
  }
  func.func @transform_0(%arg0: i32, %arg1: i32) -> (i32, i32, i32) {
    %c0_i32 = arith.constant 0 : i32
    %c0_i32_0 = arith.constant 0 : i32
    %c0_i32_1 = arith.constant 0 : i32
    return %arg0, %c0_i32, %c0_i32_0 : i32, i32, i32
  }
  func.func @transform_1(%arg0: i32, %arg1: i32) -> (i32, i32) {
    %c0_i32 = arith.constant 0 : i32
    %c0_i32_0 = arith.constant 0 : i32
    return %arg1, %c0_i32 : i32, i32
  }
  func.func @transform_2(%arg0: i32, %arg1: i32) -> (i32, i32) {
    %c0_i32 = arith.constant 0 : i32
    %c0_i32_0 = arith.constant 0 : i32
    return %arg1, %c0_i32 : i32, i32
  }
  func.func @transform_3(%arg0: i32, %arg1: i32) -> (i32, i32) {
    %c0_i32 = arith.constant 0 : i32
    %c0_i32_0 = arith.constant 0 : i32
    return %arg1, %c0_i32 : i32, i32
  }
  func.func @transform_4(%arg0: i32, %arg1: i32) -> (i32, i32) {
    %c0_i32 = arith.constant 0 : i32
    %c0_i32_0 = arith.constant 0 : i32
    %c0_i32_1 = arith.constant 0 : i32
    return %c0_i32, %c0_i32_0 : i32, i32
  }
  func.func @transform_5(%arg0: i32, %arg1: i32) -> (i32, i32, i32) {
    %c0_i32 = arith.constant 0 : i32
    %c0_i32_0 = arith.constant 0 : i32
    %c0_i32_1 = arith.constant 0 : i32
    return %arg0, %c0_i32, %c0_i32_0 : i32, i32, i32
  }
}

</mosaic_0001>

<bundles_post_ra>
// kernel: tpu_custom_call.1
= control target key start
LH: loop header
LB: loop body
LE: loop exit
PB: predicated region body
PF: predicated region fallthrough
CT: control target
= control target key end

     0   :  { %10 = vsyncpa [#allocation4], 0  ;;  %s3260_s0 = inlined_call_operand.vmem [shape: f32[2,32,256], index: 0, kind: input, shape index: {}]   ;;  %s3261_s1 = inlined_call_operand.vmem [shape: f32[96,32], index: 1, kind: input, shape index: {}]   ;;  %s3262_s2 = inlined_call_operand.vmem [shape: f32[96,1], index: 2, kind: input, shape index: {}]   ;;  %s3263_s3 = inlined_call_operand.vmem [shape: f32[32,32], index: 3, kind: input, shape index: {}]   ;;  %s3264_s4 = inlined_call_operand.vmem [shape: f32[32,1], index: 4, kind: input, shape index: {}]   ;;  %s3265_s5 = inlined_call_operand.hbm [shape: f32[2,32,256], index: 5, kind: output, shape index: {}]  }
   0x1   :  { %12 = vsyncpa [#allocation4 + $0x1], 0  ;;  %s2212_s18 = smov 0   ;;  %s2214_s19 = smov 0  }
   0x2   :  { %s2216_s20 = smov 0   ;;  %s2218_s21 = smov 0  }
   0x3   :  { %s2220_s22 = smov 0   ;;  %s2222_s23 = smov 0  }
   0x4 LB: > { %s1832_s24 = sadd.s32 4294967295, %s2175_s23   ;;  %s1833_s25 = sadd.s32 4294967294, %s2175_s23   ;;  %s2175_s23 = sphi %s2222_s23, %s18_s23   ;;  %s2171_s22 = sphi %s2220_s22, %s3360_s22   ;;  %s2167_s21 = sphi %s2218_s21, %s3359_s21   ;;  %s2163_s20 = sphi %s2216_s20, %s3358_s20   ;;  %s2159_s19 = sphi %s2214_s19, %s3357_s19   ;;  %s2155_s18 = sphi %s2212_s18, %s3356_s18  }
   0x5   : > { %s30_s26 = sadd.s32 1, %s2171_s22  ;;  %s162_s27 = sadd.s32 1, %s2163_s20 }
   0x6   : > { %p32_p0 = scmp.ge.s32.totalorder %s30_s26, 2  ;;  %p172_p1 = scmp.ne.s32.totalorder %s2163_s20, %s2159_s19 }
   0x7   : > { %p173_p2 = scmp.eq.s32.totalorder %s1832_s24, 1  ;;  %p178_p3 = scmp.ne.s32.totalorder %s2159_s19, %s2155_s18 }
   0x8   : > { %s3362_s26 = smov (%p32_p0, %s30_s26), 0  ;;  %p179_p5 = scmp.eq.s32.totalorder %s1833_s25, 1 }
   0x9   : > { %p2252_p4 = por %p173_p2, %p172_p1  ;;  %s159_s29 = ssub.s32 %s2171_s22, %s3362_s26 }
   0xa   : > { %p1839_p6 = scmp.ge.s32.totalorder %s2175_s23, 1  ;;  %p160_p7 = scmp.eq.s32.totalorder %s159_s29, 0 }
   0xb   : > { %p2259_p8 = por %p179_p5, %p178_p3  ;;  %p235_p9 = scmp.lt.s32.totalorder %s2175_s23, 3 }
   0xc   : > { %s2265_s6 = scalar_select %p160_p7, %s2163_s20, %s162_s27  }
   0xd   : > { %p236_p10 = pnand %p1839_p6, %p235_p9 }
   0xf   : > { %239 = sbr.rel (%p236_p10) target bundleno = 1394 (0x572), region = 40 }
  0x14   : > { %p278_p11 = scmp.lt.s32.totalorder %s2167_s21, 1  ;;  %v3266_v0 = vmov 0.0   ;;  %v2178_v1 = vmov 0   ;;  %v365_v2 = vld [vmem:[%s3262_s2] sm:$0xff]  ;;  %v367_v3 = vld [vmem:[%s3262_s2 + $0x10] sm:$0xff]  ;;  %v366_v4 = vld [vmem:[%s3262_s2 + $0x8] sm:$0xff] }
  0x15   : > { %538 = vmatprep.mubr.f32.mxu0 %v3266_v0  ;;  %835 = vmatprep.mubr.f32.mxu1 %v3266_v0  ;;  %v368_v5 = vld [vmem:[%s3262_s2 + $0x18] sm:$0xff]  ;;  %v371_v13 = vld [vmem:[%s3262_s2 + $0x30] sm:$0xff]  ;;  %v353_v16 = vld [vmem:[%s3261_s1] sm:$0xff]  ;;  %vm437_vm0 = vcmask 261120   ;;  %s275_s27 = sand.u32 1, %s2159_s19   ;;  %s1897_s8 = sshll.u32 %s2167_s21, 10 }
  0x16   : > { %s279_s7 = scalar_select %p278_p11, %s2167_s21, 1  ;;  %1957 = vset.pattern.permute.xlu0 %v2178_v1  ;;  %1958 = vset.pattern.permute.xlu1 %v2178_v1  ;;  %v372_v11 = vld [vmem:[%s3262_s2 + $0x38] sm:$0xff]  ;;  %v370_v17 = vld [vmem:[%s3262_s2 + $0x28] sm:$0xff]  ;;  %v369_v18 = vld [vmem:[%s3262_s2 + $0x20] sm:$0xff] }
  0x17   : > { %379 = vperm.xlu0 %1957, %v365_v2   ;;  %389 = vperm.xlu1 %1958, %v367_v3   ;;  %v354_v19 = vld [vmem:[%s3261_s1 + $0x8] sm:$0xff]  ;;  %v355_v20 = vld [vmem:[%s3261_s1 + $0x10] sm:$0xff]  ;;  %v356_v21 = vld [vmem:[%s3261_s1 + $0x18] sm:$0xff]  ;;  %s1840_s29 = sshll.u32 %s275_s27, 6  ;;  %s3215_s21 = scalar_lea.sflag [#allocation4], %s275_s27 }
  0x18   : > { %s1896_s12 = sshll.u32 %s279_s7, 6  ;;  %v357_v22 = vld [vmem:[%s3261_s1 + $0x20] sm:$0xff]  ;;  %v358_v23 = vld [vmem:[%s3261_s1 + $0x28] sm:$0xff]  ;;  %v359_v24 = vld [vmem:[%s3261_s1 + $0x30] sm:$0xff]  ;;  %s3189_s7 = scalar_lea.vmem [#allocation3], %s1840_s29 }
  0x19   : > { %s2283_s17 = scalar_lea.vmem %s3260_s0, %s1896_s12  ;;  %v360_v25 = vld [vmem:[%s3261_s1 + $0x38] sm:$0xff]  ;;  %v361_v26 = vld [vmem:[%s3261_s1 + $0x40] sm:$0xff]  ;;  %v362_v27 = vld [vmem:[%s3261_s1 + $0x48] sm:$0xff]  ;;  %s1717_s9 = sshll.u32 %s3189_s7, 4  ;;  %s3209_s9 = int_to_ptr.vmem [resolvable:$true] %s1717_s9 }
  0x1a   : > { %v308_v6 = vld [vmem:[%s2283_s17 + $0x38] sm:$0xff]  ;;  %v307_v7 = vld [vmem:[%s2283_s17 + $0x30] sm:$0xff]  ;;  %v306_v8 = vld [vmem:[%s2283_s17 + $0x28] sm:$0xff]  ;;  %s3207_s12 = scalar_lea.hbm %s3265_s5, %s1897_s8  ;;  %s2179_s13 = smov [#allocation3]  }
  0x1b   : > { %498 = vmatprep.subr.mxu0 %v308_v6  ;;  %v305_v9 = vld [vmem:[%s2283_s17 + $0x20] sm:$0xff]  ;;  %384 = vperm.xlu0 %1957, %v366_v4   ;;  %v304_v10 = vld [vmem:[%s2283_s17 + $0x18] sm:$0xff]  ;;  %v303_v12 = vld [vmem:[%s2283_s17 + $0x10] sm:$0xff]  ;;  %s2103_s14 = sshll.u32 %s2179_s13, 4  ;;  %s2104_s14 = int_to_ptr.vmem [resolvable:$false] %s2103_s14 }
  0x1c   : > { %499 = vmatpush1.msra.mxu0 %v307_v7  ;;  %394 = vperm.xlu1 %1958, %v368_v5   ;;  %v302_v14 = vld [vmem:[%s2283_s17 + $0x8] sm:$0xff]  ;;  %v301_v15 = vld [vmem:[%s2283_s17] sm:$0xff]  ;;  %v363_v28 = vld [vmem:[%s3261_s1 + $0x50] sm:$0xff]  ;;  %s2105_s15 = scalar_lea.vmem %s2104_s14, 2048  ;;  %p2106_p1 = scmp.lt.s32.totalorder %s3209_s9, %s2104_s14 }
  0x1d   : > { %500 = vmatprep.subr.mxu0 %v306_v8  ;;  %v364_v29 = vld [vmem:[%s3261_s1 + $0x58] sm:$0xff]  ;;  %v374_v7 = vld [vmem:[%s3262_s2 + $0x48] sm:$0xff] }
  0x1e   : > { %501 = vmatpush1.msra.mxu0 %v305_v9  ;;  %v376_v8 = vld [vmem:[%s3262_s2 + $0x58] sm:$0xff]  ;;  %v313_v9 = vld [vmem:[%s3264_s4] sm:$0xff] }
  0x1f   : > { %502 = vmatprep.subr.mxu0 %v304_v10  ;;  %414 = vperm.xlu0 %1957, %v372_v11   ;;  %v373_v10 = vld [vmem:[%s3262_s2 + $0x40] sm:$0xff]  ;;  %v314_v11 = vld [vmem:[%s3264_s4 + $0x8] sm:$0xff] }
  0x20   : > { %503 = vmatpush1.msra.mxu0 %v303_v12  ;;  %409 = vperm.xlu1 %1958, %v371_v13   ;;  %v375_v12 = vld [vmem:[%s3262_s2 + $0x50] sm:$0xff] }
  0x21   : > { %504 = vmatprep.subr.mxu0 %v302_v14  ;;  %v315_v13 = vld [vmem:[%s3264_s4 + $0x10] sm:$0xff]  ;;  %v316_v14 = vld [vmem:[%s3264_s4 + $0x18] sm:$0xff] }
  0x22   : > { %505 = vmatpush1.msra.mxu0 %v301_v15 }
  0x23   : > { %1843 = vmatmul.mubr.msk.f32.vlgmr.msra.gmra.mxu0 %vm437_vm0, %v353_v16  ;;  %404 = vperm.xlu0 %1957, %v370_v17  }
  0x24   : > { %544 = vmatprep.mubr.f32.mxu0 %v3266_v0  ;;  %399 = vperm.xlu1 %1958, %v369_v18  }
  0x27   : > { %1844 = vmatmul.mubr.msk.f32.gmra.mxu0 %vm437_vm0, %v354_v19 }
  0x28   : > { %550 = vmatprep.mubr.f32.mxu0 %v3266_v0 }
  0x2b   : > { %1845 = vmatmul.mubr.msk.f32.gmra.mxu0 %vm437_vm0, %v355_v20 }
  0x2c   : > { %556 = vmatprep.mubr.f32.mxu0 %v3266_v0 }
  0x2f   : > { %1846 = vmatmul.mubr.msk.f32.gmra.mxu0 %vm437_vm0, %v356_v21 }
  0x30   : > { %562 = vmatprep.mubr.f32.mxu0 %v3266_v0 }
  0x33   : > { %1847 = vmatmul.mubr.msk.f32.gmra.mxu0 %vm437_vm0, %v357_v22 }
  0x34   : > { %568 = vmatprep.mubr.f32.mxu0 %v3266_v0 }
  0x37   : > { %1848 = vmatmul.mubr.msk.f32.gmra.mxu0 %vm437_vm0, %v358_v23 }
  0x38   : > { %574 = vmatprep.mubr.f32.mxu0 %v3266_v0 }
  0x3b   : > { %1849 = vmatmul.mubr.msk.f32.gmra.mxu0 %vm437_vm0, %v359_v24 }
  0x3c   : > { %580 = vmatprep.mubr.f32.mxu0 %v3266_v0 }
  0x3f   : > { %1850 = vmatmul.mubr.msk.f32.gmra.mxu0 %vm437_vm0, %v360_v25 }
  0x40   : > { %586 = vmatprep.mubr.f32.mxu0 %v3266_v0 }
  0x43   : > { %1851 = vmatmul.mubr.msk.f32.gmra.mxu0 %vm437_vm0, %v361_v26 }
  0x44   : > { %592 = vmatprep.mubr.f32.mxu0 %v3266_v0 }
  0x47   : > { %1852 = vmatmul.mubr.msk.f32.gmra.mxu0 %vm437_vm0, %v362_v27 }
  0x48   : > { %598 = vmatprep.mubr.f32.mxu0 %v3266_v0 }
  0x4b   : > { %1853 = vmatmul.mubr.msk.f32.gmra.mxu0 %vm437_vm0, %v363_v28 }
  0x4c   : > { %604 = vmatprep.mubr.f32.mxu0 %v3266_v0 }
  0x4f   : > { %1854 = vmatmul.mubr.msk.f32.gmra.mxu0 %vm437_vm0, %v364_v29 }
  0x92   : > { %v380_v30 = vpop.permute.xlu0 %379  ;;  %v390_v38 = vpop.permute.xlu1 %389 }
  0x96   : > { %v385_v35 = vpop.permute.xlu0 %384 }
  0x97   : > { %v395_v45 = vpop.permute.xlu1 %394 }
  0x9a   : > { %v415_v56 = vpop.permute.xlu0 %414 }
  0x9b   : > { %v410_v58 = vpop.permute.xlu1 %409 }
  0x9e   : > { %v405_v63 = vpop.permute.xlu0 %404 }
  0x9f   : > { %v400_v3 = vpop.permute.xlu1 %399 }
  0xe3   : > { %v540_v31 = vpop.f32.mrf.mxu0 }
  0xe4   : > { %v541_v32 = vadd.f32 %v540_v31, %v380_v30 }
  0xe5   : > { %v542_v33 = vpop.f32.mrf.mxu0 }
  0xe6   : > { %v543_v34 = vadd.f32 %v542_v33, %v380_v30  ;;  %611 = vxpose.xlu0.b32.start [1/4] (short) %v541_v32, 128 }
  0xe7   : > { %v546_v36 = vpop.f32.mrf.mxu0 }
  0xe8   : > { %v547_v37 = vadd.f32 %v546_v36, %v385_v35  ;;  %643 = vxpose.xlu1.b32.start [1/4] (short) %v543_v34, 128 }
  0xe9   : > { %v548_v39 = vpop.f32.mrf.mxu0 }
  0xea   : > { %v549_v40 = vadd.f32 %v548_v39, %v385_v35  ;;  %612 = vxpose.xlu0.b32.cont [2/4] (short) %v547_v37, 128 }
  0xeb   : > { %v552_v41 = vpop.f32.mrf.mxu0 }
  0xec   : > { %v553_v42 = vadd.f32 %v552_v41, %v390_v38  ;;  %644 = vxpose.xlu1.b32.cont [2/4] (short) %v549_v40, 128 }
  0xed   : > { %v554_v43 = vpop.f32.mrf.mxu0 }
  0xee   : > { %v555_v44 = vadd.f32 %v554_v43, %v390_v38  ;;  %613 = vxpose.xlu0.b32.cont [3/4] (short) %v553_v42, 128 }
  0xef   : > { %v558_v46 = vpop.f32.mrf.mxu0 }
  0xf0   : > { %v559_v47 = vadd.f32 %v558_v46, %v395_v45  ;;  %645 = vxpose.xlu1.b32.cont [3/4] (short) %v555_v44, 128 }
  0xf1   : > { %v560_v48 = vpop.f32.mrf.mxu0 }
  0xf2   : > { %v561_v49 = vadd.f32 %v560_v48, %v395_v45  ;;  %614 = vxpose.xlu0.b32.end [4/4] (short) %v559_v47, 128 }
  0xf3   : > { %v564_v50 = vpop.f32.mrf.mxu0 }
  0xf4   : > { %646 = vxpose.xlu1.b32.end [4/4] (short) %v561_v49, 128  ;;  %v565_v6 = vadd.f32 %v564_v50, %v400_v3 }
  0xf5   : > { %v566_v51 = vpop.f32.mrf.mxu0 }
  0xf6   : > { %v567_v5 = vadd.f32 %v566_v51, %v400_v3 }
  0xf7   : > { %v570_v52 = vpop.f32.mrf.mxu0 }
  0xf8   : > { %v571_v4 = vadd.f32 %v570_v52, %v405_v63 }
  0xf9   : > { %v572_v53 = vpop.f32.mrf.mxu0 }
  0xfa   : > { %v573_v2 = vadd.f32 %v572_v53, %v405_v63 }
  0xfb   : > { %v576_v54 = vpop.f32.mrf.mxu0 }
  0xfc   : > { %v577_v1 = vadd.f32 %v576_v54, %v410_v58 }
  0xfd   : > { %v578_v55 = vpop.f32.mrf.mxu0 }
  0xfe   : > { %v579_v62 = vadd.f32 %v578_v55, %v410_v58 }
  0xff   : > { %v582_v57 = vpop.f32.mrf.mxu0 }
 0x100   : > { %v583_v61 = vadd.f32 %v582_v57, %v415_v56 }
 0x101   : > { %v584_v59 = vpop.f32.mrf.mxu0 }
 0x102   : > { %v585_v60 = vadd.f32 %v584_v59, %v415_v56 }
 0x103   : > { %v2439_v42 = vpop.f32.mrf.mxu0 }
 0x104   : > { %795 = vmatprep.subr.mxu1 %v585_v60  ;;  %3297 = vst [vmem:[#allocation6_spill] sm:$0xff] %v2439_v42 }
 0x105   : > { %796 = vmatpush1.msra.mxu1 %v583_v61  ;;  %v590_v43 = vpop.f32.mrf.mxu0 }
 0x106   : > { %797 = vmatprep.subr.mxu1 %v579_v62 }
 0x107   : > { %798 = vmatpush1.msra.mxu1 %v577_v1 }
 0x108   : > { %799 = vmatprep.subr.mxu1 %v573_v2 }
 0x109   : > { %800 = vmatpush1.msra.mxu1 %v571_v4 }
 0x10a   : > { %801 = vmatprep.subr.mxu1 %v567_v5 }
 0x10b   : > { %802 = vmatpush1.msra.mxu1 %v565_v6 }
 0x142   : > { %424 = vperm.xlu1 %1958, %v374_v7  }
 0x146   : > { %434 = vperm.xlu1 %1958, %v376_v8  }
 0x14a   : > { %319 = vperm.xlu1 %1958, %v313_v9  }
 0x14b   : > { %419 = vperm.xlu0 %1957, %v373_v10  }
 0x14e   : > { %324 = vperm.xlu1 %1958, %v314_v11  }
 0x14f   : > { %429 = vperm.xlu0 %1957, %v375_v12  }
 0x152   : > { %329 = vperm.xlu1 %1958, %v315_v13  }
 0x156   : > { %334 = vperm.xlu1 %1958, %v316_v14  }
 0x162   : > { %v627_v15 = vpop.trf.xlu0 }
 0x163   : > { %1855 = vmatmul.mubr.msk.f32.vlgmr.msra.gmra.mxu1 %vm437_vm0, %v627_v15 }
 0x164   : > { %841 = vmatprep.mubr.f32.mxu1 %v3266_v0  ;;  %v659_v24 = vpop.trf.xlu1 }
 0x166   : > { %v628_v16 = vpop.trf.xlu0 }
 0x167   : > { %1856 = vmatmul.mubr.msk.f32.gmra.mxu1 %vm437_vm0, %v628_v16 }
 0x168   : > { %847 = vmatprep.mubr.f32.mxu1 %v3266_v0  ;;  %v660_v26 = vpop.trf.xlu1 }
 0x16a   : > { %v629_v17 = vpop.trf.xlu0 }
 0x16b   : > { %1857 = vmatmul.mubr.msk.f32.gmra.mxu1 %vm437_vm0, %v629_v17 }
 0x16c   : > { %853 = vmatprep.mubr.f32.mxu1 %v3266_v0  ;;  %v661_v29 = vpop.trf.xlu1 }
 0x16e   : > { %v630_v18 = vpop.trf.xlu0 }
 0x16f   : > { %1858 = vmatmul.mubr.msk.f32.gmra.mxu1 %vm437_vm0, %v630_v18 }
 0x170   : > { %859 = vmatprep.mubr.f32.mxu1 %v3266_v0  ;;  %v662_v31 = vpop.trf.xlu1 }
 0x172   : > { %v631_v19 = vpop.trf.xlu0 }
 0x173   : > { %1859 = vmatmul.mubr.msk.f32.gmra.mxu1 %vm437_vm0, %v631_v19 }
 0x174   : > { %865 = vmatprep.mubr.f32.mxu1 %v3266_v0  ;;  %v663_v34 = vpop.trf.xlu1 }
 0x176   : > { %v632_v20 = vpop.trf.xlu0 }
 0x177   : > { %1860 = vmatmul.mubr.msk.f32.gmra.mxu1 %vm437_vm0, %v632_v20 }
 0x178   : > { %871 = vmatprep.mubr.f32.mxu1 %v3266_v0  ;;  %v664_v36 = vpop.trf.xlu1 }
 0x17a   : > { %v633_v21 = vpop.trf.xlu0 }
 0x17b   : > { %1861 = vmatmul.mubr.msk.f32.gmra.mxu1 %vm437_vm0, %v633_v21 }
 0x17c   : > { %877 = vmatprep.mubr.f32.mxu1 %v3266_v0  ;;  %v665_v37 = vpop.trf.xlu1 }
 0x17e   : > { %v634_v22 = vpop.trf.xlu0 }
 0x17f   : > { %1862 = vmatmul.mubr.msk.f32.gmra.mxu1 %vm437_vm0, %v634_v22 }
 0x180   : > { %883 = vmatprep.mubr.f32.mxu1 %v3266_v0  ;;  %v666_v38 = vpop.trf.xlu1 }
 0x182   : > { %v635_v23 = vpop.trf.xlu0 }
 0x183   : > { %1863 = vmatmul.mubr.msk.f32.gmra.mxu1 %vm437_vm0, %v635_v23 }
 0x184   : > { %889 = vmatprep.mubr.f32.mxu1 %v3266_v0  ;;  %v667_v39 = vpop.trf.xlu1 }
 0x186   : > { %v636_v25 = vpop.trf.xlu0 }
 0x187   : > { %1864 = vmatmul.mubr.msk.f32.gmra.mxu1 %vm437_vm0, %v636_v25 }
 0x188   : > { %895 = vmatprep.mubr.f32.mxu1 %v3266_v0  ;;  %v668_v40 = vpop.trf.xlu1 }
 0x18a   : > { %v637_v27 = vpop.trf.xlu0 }
 0x18b   : > { %1865 = vmatmul.mubr.msk.f32.gmra.mxu1 %vm437_vm0, %v637_v27 }
 0x18c   : > { %901 = vmatprep.mubr.f32.mxu1 %v3266_v0  ;;  %v669_v41 = vpop.trf.xlu1 }
 0x18e   : > { %v638_v28 = vpop.trf.xlu0 }
 0x18f   : > { %1866 = vmatmul.mubr.msk.f32.gmra.mxu1 %vm437_vm0, %v638_v28 }
 0x190   : > { %907 = vmatprep.mubr.f32.mxu1 %v3266_v0  ;;  %v670_v44 = vpop.trf.xlu1 }
 0x192   : > { %v639_v30 = vpop.trf.xlu0 }
 0x193   : > { %1867 = vmatmul.mubr.msk.f32.gmra.mxu1 %vm437_vm0, %v639_v30 }
 0x194   : > { %913 = vmatprep.mubr.f32.mxu1 %v3266_v0  ;;  %v671_v47 = vpop.trf.xlu1 }
 0x196   : > { %v640_v32 = vpop.trf.xlu0 }
 0x197   : > { %1868 = vmatmul.mubr.msk.f32.gmra.mxu1 %vm437_vm0, %v640_v32 }
 0x198   : > { %919 = vmatprep.mubr.f32.mxu1 %v3266_v0  ;;  %v672_v48 = vpop.trf.xlu1 }
 0x19a   : > { %v641_v33 = vpop.trf.xlu0 }
 0x19b   : > { %1869 = vmatmul.mubr.msk.f32.gmra.mxu1 %vm437_vm0, %v641_v33 }
 0x19c   : > { %925 = vmatprep.mubr.f32.mxu1 %v3266_v0  ;;  %v673_v49 = vpop.trf.xlu1 }
 0x19e   : > { %v642_v35 = vpop.trf.xlu0 }
 0x19f   : > { %1870 = vmatmul.mubr.msk.f32.gmra.mxu1 %vm437_vm0, %v642_v35 }
 0x1a0   : > { %931 = vmatprep.mubr.f32.mxu1 %v3266_v0  ;;  %v674_v50 = vpop.trf.xlu1 }
 0x1a3   : > { %1871 = vmatmul.mubr.msk.f32.gmra.mxu1 %vm437_vm0, %v659_v24 }
 0x1a4   : > { %937 = vmatprep.mubr.f32.mxu1 %v3266_v0 }
 0x1a7   : > { %1872 = vmatmul.mubr.msk.f32.gmra.mxu1 %vm437_vm0, %v660_v26 }
 0x1a8   : > { %943 = vmatprep.mubr.f32.mxu1 %v3266_v0 }
 0x1ab   : > { %1873 = vmatmul.mubr.msk.f32.gmra.mxu1 %vm437_vm0, %v661_v29 }
 0x1ac   : > { %949 = vmatprep.mubr.f32.mxu1 %v3266_v0 }
 0x1af   : > { %1874 = vmatmul.mubr.msk.f32.gmra.mxu1 %vm437_vm0, %v662_v31 }
 0x1b0   : > { %955 = vmatprep.mubr.f32.mxu1 %v3266_v0 }
 0x1b3   : > { %1875 = vmatmul.mubr.msk.f32.gmra.mxu1 %vm437_vm0, %v663_v34 }
 0x1b4   : > { %961 = vmatprep.mubr.f32.mxu1 %v3266_v0 }
 0x1b7   : > { %1876 = vmatmul.mubr.msk.f32.gmra.mxu1 %vm437_vm0, %v664_v36 }
 0x1b8   : > { %967 = vmatprep.mubr.f32.mxu1 %v3266_v0 }
 0x1bb   : > { %1877 = vmatmul.mubr.msk.f32.gmra.mxu1 %vm437_vm0, %v665_v37 }
 0x1bc   : > { %973 = vmatprep.mubr.f32.mxu1 %v3266_v0 }
 0x1bf   : > { %1878 = vmatmul.mubr.msk.f32.gmra.mxu1 %vm437_vm0, %v666_v38 }
 0x1c0   : > { %979 = vmatprep.mubr.f32.mxu1 %v3266_v0 }
 0x1c3   : > { %1879 = vmatmul.mubr.msk.f32.gmra.mxu1 %vm437_vm0, %v667_v39 }
 0x1c4   : > { %985 = vmatprep.mubr.f32.mxu1 %v3266_v0 }
 0x1c6   : > { %v2443_v45 = vpop.permute.xlu0 %419 }
 0x1c7   : > { %3298 = vst [vmem:[#allocation7_spill] sm:$0xff] %v2443_v45  ;;  %v591_v46 = vadd.f32 %v590_v43, %v2443_v45  ;;  %1880 = vmatmul.mubr.msk.f32.gmra.mxu1 %vm437_vm0, %v668_v40 }
 0x1c8   : > { %991 = vmatprep.mubr.f32.mxu1 %v3266_v0 }
 0x1c9   : > { %1498 = vmatprep.mubr.f32.mxu0 %v591_v46 }
 0x1cb   : > { %1881 = vmatmul.mubr.msk.f32.gmra.mxu1 %vm437_vm0, %v669_v41 }
 0x1cc   : > { %997 = vmatprep.mubr.f32.mxu1 %v3266_v0 }
 0x1cf   : > { %1882 = vmatmul.mubr.msk.f32.gmra.mxu1 %vm437_vm0, %v670_v44 }
 0x1d0   : > { %1003 = vmatprep.mubr.f32.mxu1 %v3266_v0 }
 0x1d3   : > { %1883 = vmatmul.mubr.msk.f32.gmra.mxu1 %vm437_vm0, %v671_v47 }
 0x1d4   : > { %1009 = vmatprep.mubr.f32.mxu1 %v3266_v0 }
 0x1d7   : > { %1884 = vmatmul.mubr.msk.f32.gmra.mxu1 %vm437_vm0, %v672_v48 }
 0x1d8   : > { %1015 = vmatprep.mubr.f32.mxu1 %v3266_v0 }
 0x1db   : > { %1885 = vmatmul.mubr.msk.f32.gmra.mxu1 %vm437_vm0, %v673_v49 }
 0x1dc   : > { %1021 = vmatprep.mubr.f32.mxu1 %v3266_v0 }
 0x1df   : > { %1886 = vmatmul.mubr.msk.f32.gmra.mxu1 %vm437_vm0, %v674_v50 }
 0x1e0   : > { %1643 = vmatprep.mubr.f32.mxu1 %v3266_v0 }
 0x223   : > { %v2460_v51 = vpop.f32.mrf.mxu1 }
 0x225   : > { %v2462_v52 = vpop.f32.mrf.mxu1 }
 0x227   : > { %v2464_v53 = vpop.f32.mrf.mxu1 }
 0x229   : > { %v2466_v54 = vpop.f32.mrf.mxu1 }
 0x22b   : > { %v2468_v55 = vpop.f32.mrf.mxu1 }
 0x22c   : > { %v1028_v37 = vmax.f32 %v2460_v51, %v2468_v55 }
 0x22d   : > { %v2470_v56 = vpop.f32.mrf.mxu1 }
 0x22f   : > { %v2472_v57 = vpop.f32.mrf.mxu1 }
 0x230   : > { %v1029_v38 = vmax.f32 %v2464_v53, %v2472_v57 }
 0x231   : > { %v2474_v58 = vpop.f32.mrf.mxu1 }
 0x232   : > { %3299 = vst [vmem:[#allocation8_spill] sm:$0xff] %v2474_v58 }
 0x233   : > { %v2476_v59 = vpop.f32.mrf.mxu1 }
 0x234   : > { %v1030_v40 = vmax.f32 %v1028_v37, %v2476_v59 }
 0x235   : > { %v2478_v60 = vpop.f32.mrf.mxu1 }
 0x237   : > { %v2480_v61 = vpop.f32.mrf.mxu1 }
 0x238   : > { %v1031_v41 = vmax.f32 %v1029_v38, %v2480_v61 }
 0x239   : > { %v2482_v62 = vpop.f32.mrf.mxu1 }
 0x23b   : > { %v2484_v63 = vpop.f32.mrf.mxu1 }
 0x23c   : > { %v1032_v44 = vmax.f32 %v1030_v40, %v2484_v63 }
 0x23d   : > { %v2486_v1 = vpop.f32.mrf.mxu1 }
 0x23f   : > { %v2488_v2 = vpop.f32.mrf.mxu1 }
 0x240   : > { %v1033_v46 = vmax.f32 %v1031_v41, %v2488_v2 }
 0x241   : > { %v2490_v3 = vpop.f32.mrf.mxu1 }
 0x243   : > { %v2492_v4 = vpop.f32.mrf.mxu1 }
 0x244   : > { %3300 = vst [vmem:[#allocation9_spill] sm:$0xff] %v2492_v4  ;;  %v1034_v48 = vmax.f32 %v1032_v44, %v2492_v4 }
 0x245   : > { %v2494_v5 = vpop.f32.mrf.mxu1 }
 0x247   : > { %v2496_v6 = vpop.f32.mrf.mxu1 }
 0x248   : > { %v1035_v49 = vmax.f32 %v1033_v46, %v2496_v6 }
 0x249   : > { %v2498_v7 = vpop.f32.mrf.mxu1 }
 0x24b   : > { %v2500_v8 = vpop.f32.mrf.mxu1 }
 0x24c   : > { %3301 = vst [vmem:[#allocation10_spill] sm:$0xff] %v2500_v8  ;;  %v1036_v0 = vmax.f32 %v1034_v48, %v2500_v8 }
 0x24d   : > { %v2502_v9 = vpop.f32.mrf.mxu1 }
 0x24f   : > { %v2504_v10 = vpop.f32.mrf.mxu1 }
 0x250   : > { %v1037_v37 = vmax.f32 %v1035_v49, %v2504_v10 }
 0x251   : > { %v2506_v11 = vpop.f32.mrf.mxu1 }
 0x253   : > { %v2508_v12 = vpop.f32.mrf.mxu1 }
 0x254   : > { %3302 = vst [vmem:[#allocation11_spill] sm:$0xff] %v2508_v12  ;;  %v1038_v38 = vmax.f32 %v1036_v0, %v2508_v12 }
 0x255   : > { %v2510_v13 = vpop.f32.mrf.mxu1 }
 0x257   : > { %v2512_v14 = vpop.f32.mrf.mxu1 }
 0x258   : > { %v1039_v40 = vmax.f32 %v1037_v37, %v2512_v14  ;;  %v1066_v37 = vmax.f32 %v2466_v54, %v2474_v58 }
 0x259   : > { %v2514_v15 = vpop.f32.mrf.mxu1 }
 0x25b   : > { %v2516_v16 = vpop.f32.mrf.mxu1 }
 0x25c   : > { %v1040_v41 = vmax.f32 %v1038_v38, %v2516_v16 }
 0x25d   : > { %v2518_v17 = vpop.f32.mrf.mxu1 }
 0x25f   : > { %v2520_v18 = vpop.f32.mrf.mxu1 }
 0x260   : > { %3303 = vst [vmem:[#allocation12_spill] sm:$0xff] %v2520_v18  ;;  %v1041_v44 = vmax.f32 %v1039_v40, %v2520_v18 }
 0x261   : > { %v2522_v19 = vpop.f32.mrf.mxu1 }
 0x263   : > { %v2524_v20 = vpop.f32.mrf.mxu1 }
 0x264   : > { %v1042_v46 = vmax.f32 %v1040_v41, %v2524_v20  ;;  %v1065_v41 = vmax.f32 %v2462_v52, %v2470_v56 }
 0x265   : > { %v2526_v21 = vpop.f32.mrf.mxu1 }
 0x267   : > { %v2528_v22 = vpop.f32.mrf.mxu1 }
 0x268   : > { %v1043_v48 = vmax.f32 %v1041_v44, %v2528_v22  ;;  %v1068_v44 = vmax.f32 %v1066_v37, %v2482_v62 }
 0x269   : > { %v2530_v23 = vpop.f32.mrf.mxu1 }
 0x26a   : > { %v1070_v58 = vmax.f32 %v1068_v44, %v2490_v3 }
 0x26b   : > { %v2532_v24 = vpop.f32.mrf.mxu1 }
 0x26c   : > { %3304 = vst [vmem:[#allocation13_spill] sm:$0xff] %v2532_v24  ;;  %v1044_v49 = vmax.f32 %v1042_v46, %v2532_v24  ;;  %v1067_v24 = vmax.f32 %v1065_v41, %v2478_v60  ;;  %v1072_v37 = vmax.f32 %v1070_v58, %v2498_v7 }
 0x26d   : > { %v2534_v25 = vpop.f32.mrf.mxu1 }
 0x26e   : > { %v1074_v44 = vmax.f32 %v1072_v37, %v2506_v11 }
 0x26f   : > { %v2536_v26 = vpop.f32.mrf.mxu1 }
 0x270   : > { %3305 = vst [vmem:[#allocation14_spill] sm:$0xff] %v2536_v26  ;;  %v1045_v0 = vmax.f32 %v1043_v48, %v2536_v26  ;;  %v1076_v58 = vmax.f32 %v1074_v44, %v2514_v15 }
 0x271   : > { %v2538_v27 = vpop.f32.mrf.mxu1 }
 0x273   : > { %v2540_v28 = vpop.f32.mrf.mxu1 }
 0x274   : > { %3306 = vst [vmem:[#allocation15_spill] sm:$0xff] %v2540_v28  ;;  %v1046_v38 = vmax.f32 %v1044_v49, %v2540_v28  ;;  %v1069_v28 = vmax.f32 %v1067_v24, %v2486_v1 }
 0x275   : > { %v2542_v29 = vpop.f32.mrf.mxu1 }
 0x276   : > { %v1071_v41 = vmax.f32 %v1069_v28, %v2494_v5  ;;  %v1078_v28 = vmax.f32 %v1076_v58, %v2522_v19 }
 0x277   : > { %v2544_v30 = vpop.f32.mrf.mxu1 }
 0x278   : > { %3307 = vst [vmem:[#allocation16_spill] sm:$0xff] %v2544_v30  ;;  %v1047_v40 = vmax.f32 %v1045_v0, %v2544_v30  ;;  %v1073_v24 = vmax.f32 %v1071_v41, %v2502_v9 }
 0x279   : > { %v2546_v31 = vpop.f32.mrf.mxu1 }
 0x27b   : > { %v2548_v32 = vpop.f32.mrf.mxu1 }
 0x27c   : > { %v1048_v46 = vmax.f32 %v1046_v38, %v2548_v32 }
 0x27d   : > { %v2550_v33 = vpop.f32.mrf.mxu1 }
 0x27f   : > { %v2552_v34 = vpop.f32.mrf.mxu1 }
 0x280   : > { %3308 = vst [vmem:[#allocation17_spill] sm:$0xff] %v2552_v34  ;;  %v1049_v48 = vmax.f32 %v1047_v40, %v2552_v34 }
 0x281   : > { %v2554_v35 = vpop.f32.mrf.mxu1 }
 0x283   : > { %v2556_v36 = vpop.f32.mrf.mxu1 }
 0x284   : > { %v1050_v49 = vmax.f32 %v1048_v46, %v2556_v36 }
 0x285   : > { %v2562_v39 = vpop.f32.mrf.mxu1 }
 0x287   : > { %v2566_v43 = vpop.f32.mrf.mxu1 }
 0x288   : > { %3309 = vst [vmem:[#allocation18_spill] sm:$0xff] %v2566_v43  ;;  %v1051_v0 = vmax.f32 %v1049_v48, %v2566_v43 }
 0x289   : > { %v2570_v47 = vpop.f32.mrf.mxu1 }
 0x28b   : > { %v2574_v50 = vpop.f32.mrf.mxu1 }
 0x28c   : > { %3310 = vst [vmem:[#allocation19_spill] sm:$0xff] %v2574_v50  ;;  %v1052_v38 = vmax.f32 %v1050_v49, %v2574_v50 }
 0x28d   : > { %v2578_v42 = vpop.f32.mrf.mxu1 }
 0x28f   : > { %v2582_v45 = vpop.f32.mrf.mxu1 }
 0x290   : > { %3311 = vst [vmem:[#allocation20_spill] sm:$0xff] %v2582_v45  ;;  %v1053_v40 = vmax.f32 %v1051_v0, %v2582_v45  ;;  %v1075_v45 = vmax.f32 %v1073_v24, %v2510_v13 }
 0x291   : > { %v2586_v4 = vpop.f32.mrf.mxu1 }
 0x292   : > { %v1077_v37 = vmax.f32 %v1075_v45, %v2518_v17 }
 0x293   : > { %v2590_v8 = vpop.f32.mrf.mxu1 }
 0x294   : > { %3312 = vst [vmem:[#allocation21_spill] sm:$0xff] %v2590_v8  ;;  %v1054_v46 = vmax.f32 %v1052_v38, %v2590_v8  ;;  %v1080_v38 = vmax.f32 %v1078_v28, %v2530_v23 }
 0x295   : > { %v2594_v12 = vpop.f32.mrf.mxu1 }
 0x296   : > { %v1082_v41 = vmax.f32 %v1080_v38, %v2538_v27 }
 0x297   : > { %v2600_v18 = vpop.f32.mrf.mxu1 }
 0x298   : > { %3313 = vst [vmem:[#allocation22_spill] sm:$0xff] %v2600_v18  ;;  %v1055_v48 = vmax.f32 %v1053_v40, %v2600_v18  ;;  %v1079_v18 = vmax.f32 %v1077_v37, %v2526_v21 }
 0x299   : > { %v2607_v26 = vpop.f32.mrf.mxu1 }
 0x29a   : > { %v1081_v44 = vmax.f32 %v1079_v18, %v2534_v25 }
 0x29b   : > { %v2613_v30 = vpop.f32.mrf.mxu1 }
 0x29c   : > { %v1056_v49 = vmax.f32 %v1054_v46, %v2613_v30  ;;  %v1084_v46 = vmax.f32 %v1082_v41, %v2546_v31  ;;  %v1083_v24 = vmax.f32 %v1081_v44, %v2542_v29 }
 0x29d   : > { %v2619_v34 = vpop.f32.mrf.mxu1 }
 0x29e   : > { %v1086_v58 = vmax.f32 %v1084_v46, %v2554_v35  ;;  %v1085_v45 = vmax.f32 %v1083_v24, %v2550_v33 }
 0x29f   : > { %v2625_v43 = vpop.f32.mrf.mxu1 }
 0x2a0   : > { %v1057_v0 = vmax.f32 %v1055_v48, %v2625_v43  ;;  %v1087_v37 = vmax.f32 %v1085_v45, %v2562_v39 }
 0x2a2   : > { %v1058_v50 = vmax.f32 %v1056_v49, %v1057_v0  ;;  %v1088_v0 = vmax.f32 %v1086_v58, %v2570_v47  ;;  %v1089_v18 = vmax.f32 %v1087_v37, %v2578_v42 }
 0x2a4   : > { %v1059_v40 = vrot.slane %v1058_v50, 4  ;;  %v1090_v38 = vmax.f32 %v1088_v0, %v2586_v4  ;;  %v1091_v44 = vmax.f32 %v1089_v18, %v2594_v12 }
 0x2a6   : > { %v1060_v8 = vmax.f32 %v1058_v50, %v1059_v40  ;;  %v2645_v50 = vpop.f32.mrf.mxu1  ;;  %v1092_v40 = vmax.f32 %v1090_v38, %v2607_v26  ;;  %v1093_v46 = vmax.f32 %v1091_v44, %v2619_v34 }
 0x2a8   : > { %v1061_v48 = vrot.slane %v1060_v8, 2 }
 0x2aa   : > { %v1062_v49 = vmax.f32 %v1060_v8, %v1061_v48  ;;  %v1094_v8 = vmax.f32 %v1092_v40, %v2645_v50 }
 0x2ac   : > { %v1063_v28 = vrot.slane %v1062_v49, 1  ;;  %v1095_v45 = vmax.f32 %v1093_v46, %v1094_v8 }
 0x2ae   : > { %v2649_v41 = vmax.f32 %v1062_v49, %v1063_v28  ;;  %v1096_v18 = vrot.slane %v1095_v45, 4 }
 0x2b0   : > { %v1102_v48 = vsub.f32 %v2460_v51, %v2649_v41  ;;  %v1104_v24 = vsub.f32 %v2464_v53, %v2649_v41  ;;  %v1106_v58 = vsub.f32 %v2468_v55, %v2649_v41  ;;  %v1108_v49 = vsub.f32 %v2472_v57, %v2649_v41 }
 0x2b1   : > { %v1110_v37 = vsub.f32 %v2476_v59, %v2649_v41  ;;  %v1112_v51 = vsub.f32 %v2480_v61, %v2649_v41  ;;  %v1114_v55 = vsub.f32 %v2484_v63, %v2649_v41  ;;  %v1097_v44 = vmax.f32 %v1095_v45, %v1096_v18  ;;  %v3314_v59 = vld [vmem:[#allocation9_spill] sm:$0xff]  ;;  %v3315_v63 = vld [vmem:[#allocation10_spill] sm:$0xff]  ;;  %v3318_v18 = vld [vmem:[#allocation11_spill] sm:$0xff] }
 0x2b2   : > { %v1166_v0 = vmul.f32 1.442695, %v1102_v48  ;;  %v1170_v28 = vmul.f32 1.442695, %v1104_v24  ;;  %v1174_v38 = vmul.f32 1.442695, %v1106_v58  ;;  %v1116_v57 = vsub.f32 %v2488_v2, %v2649_v41 }
 0x2b3   : > { %v1178_v53 = vmul.f32 1.442695, %v1108_v49  ;;  %v1182_v40 = vmul.f32 1.442695, %v1110_v37  ;;  %v1186_v8 = vmul.f32 1.442695, %v1112_v51  ;;  %v1118_v46 = vsub.f32 %v3314_v59, %v2649_v41 }
 0x2b4   : > { %1959 = vpow2.f32 %v1166_v0  ;;  %v1190_v48 = vmul.f32 1.442695, %v1114_v55  ;;  %v1098_v24 = vrot.slane %v1097_v44, 2  ;;  %v1120_v61 = vsub.f32 %v2496_v6, %v2649_v41 }
 0x2b5   : > { %1961 = vpow2.f32 %v1170_v28  ;;  %v1194_v58 = vmul.f32 1.442695, %v1116_v57  ;;  %v1122_v49 = vsub.f32 %v3315_v63, %v2649_v41  ;;  %v1198_v45 = vmul.f32 1.442695, %v1118_v46 }
 0x2b6   : > { %1963 = vpow2.f32 %v1174_v38  ;;  %v1099_v0 = vmax.f32 %v1097_v44, %v1098_v24  ;;  %v1124_v28 = vsub.f32 %v2504_v10, %v2649_v41  ;;  %v1202_v37 = vmul.f32 1.442695, %v1120_v61 }
 0x2b7   : > { %1965 = vpow2.f32 %v1178_v53  ;;  %v1126_v6 = vsub.f32 %v3318_v18, %v2649_v41  ;;  %v1206_v51 = vmul.f32 1.442695, %v1122_v49  ;;  %v1128_v44 = vsub.f32 %v2512_v14, %v2649_v41 }
 0x2b8   : > { %1967 = vpow2.f32 %v1182_v40  ;;  %v1100_v40 = vrot.slane %v1099_v0, 1  ;;  %v1210_v10 = vmul.f32 1.442695, %v1124_v28  ;;  %v1130_v59 = vsub.f32 %v2516_v16, %v2649_v41 }
 0x2b9   : > { %1969 = vpow2.f32 %v1186_v8  ;;  %v1214_v46 = vmul.f32 1.442695, %v1126_v6  ;;  %v1218_v63 = vmul.f32 1.442695, %v1128_v44  ;;  %v1134_v16 = vsub.f32 %v2524_v20, %v2649_v41 }
 0x2ba   : > { %1971 = vpow2.f32 %v1190_v48  ;;  %v2698_v61 = vmax.f32 %v1099_v0, %v1100_v40  ;;  %v1136_v28 = vsub.f32 %v2528_v22, %v2649_v41  ;;  %v3323_v22 = vld [vmem:[#allocation13_spill] sm:$0xff] }
 0x2bb   : > { %1973 = vpow2.f32 %v1194_v58  ;;  %v3322_v58 = vld [vmem:[#allocation12_spill] sm:$0xff]  ;;  %v1138_v44 = vsub.f32 %v3323_v22, %v2649_v41 }
 0x2bc   : > { %1975 = vpow2.f32 %v1198_v45  ;;  %v1132_v14 = vsub.f32 %v3322_v58, %v2649_v41  ;;  %v1103_v6 = vsub.f32 %v2462_v52, %v2698_v61  ;;  %v1105_v40 = vsub.f32 %v2466_v54, %v2698_v61 }
 0x2bd   : > { %1977 = vpow2.f32 %v1202_v37  ;;  %v1222_v37 = vmul.f32 1.442695, %v1130_v59  ;;  %v1107_v52 = vsub.f32 %v2470_v56, %v2698_v61  ;;  %v1238_v56 = vmul.f32 1.442695, %v1138_v44 }
 0x2be   : > { %1979 = vpow2.f32 %v1206_v51  ;;  %v1226_v51 = vmul.f32 1.442695, %v1132_v14  ;;  %v1168_v14 = vmul.f32 1.442695, %v1103_v6  ;;  %v1111_v6 = vsub.f32 %v2478_v60, %v2698_v61 }
 0x2bf   : > { %1981 = vpow2.f32 %v1210_v10  ;;  %v1230_v10 = vmul.f32 1.442695, %v1134_v16  ;;  %v1172_v16 = vmul.f32 1.442695, %v1105_v40  ;;  %v1146_v60 = vsub.f32 %v2548_v32, %v2649_v41 }
 0x2c0   : > { %1983 = vpow2.f32 %v1214_v46  ;;  %v1117_v32 = vsub.f32 %v2490_v3, %v2698_v61  ;;  %v3329_v3 = vld [vmem:[#allocation18_spill] sm:$0xff] }
 0x2c1   : > { %v2676_v2 = vpop.eup %1959  ;;  %1985 = vpow2.f32 %v1218_v63  ;;  %v3325_v63 = vld [vmem:[#allocation8_spill] sm:$0xff] }
 0x2c2   : > { %3316 = vst [vmem:[#allocation9_spill] sm:$0xff] %v2676_v2  ;;  %v2680_v38 = vpop.eup %1961  ;;  %1987 = vpow2.f32 %v1222_v37 }
 0x2c3   : > { %3317 = vst [vmem:[#allocation10_spill] sm:$0xff] %v2680_v38  ;;  %v1294_v53 = vadd.f32 %v2680_v38, %v2676_v2  ;;  %v2686_v55 = vpop.eup %1963  ;;  %1989 = vpow2.f32 %v1226_v51  ;;  %v1176_v51 = vmul.f32 1.442695, %v1107_v52 }
 0x2c4   : > { %3319 = vst [vmem:[#allocation11_spill] sm:$0xff] %v2686_v55  ;;  %v2691_v8 = vpop.eup %1965  ;;  %1991 = vpow2.f32 %v1230_v10  ;;  %v1113_v10 = vsub.f32 %v2482_v62, %v2698_v61  ;;  %v3328_v62 = vld [vmem:[#allocation17_spill] sm:$0xff] }
 0x2c5   : > { %v1295_v57 = vadd.f32 %v2686_v55, %v1294_v53  ;;  %3320 = vst [vmem:[#allocation23_spill] sm:$0xff] %v2691_v8  ;;  %v2696_v24 = vpop.eup %1967 }
 0x2c6   : > { %3321 = vst [vmem:[#allocation24_spill] sm:$0xff] %v2696_v24  ;;  %v2703_v45 = vpop.eup %1969 }
 0x2c7   : > { %v1296_v48 = vadd.f32 %v2691_v8, %v1295_v57  ;;  %v2710_v18 = vpop.eup %1971  ;;  %v1234_v57 = vmul.f32 1.442695, %v1136_v28  ;;  %v3326_v28 = vld [vmem:[#allocation15_spill] sm:$0xff] }
 0x2c8   : > { %v2717_v20 = vpop.eup %1973 }
 0x2c9   : > { %v1297_v49 = vadd.f32 %v2696_v24, %v1296_v48  ;;  %v2724_v46 = vpop.eup %1975  ;;  %v3324_v48 = vld [vmem:[#allocation14_spill] sm:$0xff]  ;;  %1993 = vpow2.f32 %v1234_v57 }
 0x2ca   : > { %v1140_v58 = vsub.f32 %v3324_v48, %v2649_v41  ;;  %v2731_v37 = vpop.eup %1977  ;;  %1995 = vpow2.f32 %v1168_v14  ;;  %v1184_v14 = vmul.f32 1.442695, %v1111_v6  ;;  %v1254_v6 = vmul.f32 1.442695, %v1146_v60 }
 0x2cb   : > { %v1298_v0 = vadd.f32 %v2703_v45, %v1297_v49  ;;  %v1109_v49 = vsub.f32 %v3325_v63, %v2698_v61  ;;  %v2738_v22 = vpop.eup %1979  ;;  %1997 = vpow2.f32 %v1172_v16  ;;  %v1148_v16 = vsub.f32 %v3328_v62, %v2649_v41 }
 0x2cc   : > { %v1242_v40 = vmul.f32 1.442695, %v1140_v58  ;;  %v2745_v57 = vpop.eup %1981  ;;  %1999 = vpow2.f32 %v1238_v56  ;;  %v1115_v58 = vsub.f32 %v2486_v1, %v2698_v61  ;;  %v1150_v1 = vsub.f32 %v2556_v36, %v2649_v41 }
 0x2cd   : > { %v1299_v53 = vadd.f32 %v2710_v18, %v1298_v0  ;;  %v1142_v0 = vsub.f32 %v3326_v28, %v2649_v41  ;;  %v1180_v44 = vmul.f32 1.442695, %v1109_v49  ;;  %2001 = vpow2.f32 %v1176_v51  ;;  %v2752_v28 = vpop.eup %1983 }
 0x2ce   : > { %2003 = vpow2.f32 %v1242_v40  ;;  %v2759_v56 = vpop.eup %1985  ;;  %v1121_v36 = vsub.f32 %v2498_v7, %v2698_v61  ;;  %v1196_v60 = vmul.f32 1.442695, %v1117_v32  ;;  %v3332_v7 = vld [vmem:[#allocation20_spill] sm:$0xff] }
 0x2cf   : > { %v1300_v59 = vadd.f32 %v2717_v20, %v1299_v53  ;;  %v1246_v52 = vmul.f32 1.442695, %v1142_v0  ;;  %2005 = vpow2.f32 %v1180_v44  ;;  %v1188_v0 = vmul.f32 1.442695, %v1113_v10  ;;  %v2766_v40 = vpop.eup %1987 }
 0x2d0   : > { %v1258_v10 = vmul.f32 1.442695, %v1148_v16  ;;  %v1123_v16 = vsub.f32 %v2502_v9, %v2698_v61  ;;  %v1156_v32 = vsub.f32 %v3332_v7, %v2649_v41  ;;  %v3335_v9 = vld [vmem:[#allocation21_spill] sm:$0xff] }
 0x2d1   : > { %v1301_v54 = vadd.f32 %v2724_v46, %v1300_v59  ;;  %v3327_v59 = vld [vmem:[#allocation16_spill] sm:$0xff]  ;;  %2007 = vpow2.f32 %v1246_v52  ;;  %v2773_v52 = vpop.eup %1989 }
 0x2d2   : > { %v1144_v48 = vsub.f32 %v3327_v59, %v2649_v41  ;;  %v1119_v59 = vsub.f32 %v2494_v5, %v2698_v61  ;;  %2009 = vpow2.f32 %v1184_v14  ;;  %v3330_v5 = vld [vmem:[#allocation19_spill] sm:$0xff]  ;;  %v2777_v14 = vpop.eup %1991 }
 0x2d3   : > { %v1302_v53 = vadd.f32 %v2731_v37, %v1301_v54  ;;  %3331 = vst [vmem:[#allocation12_spill] sm:$0xff] %v2777_v14 }
 0x2d4   : > { %v1250_v49 = vmul.f32 1.442695, %v1144_v48  ;;  %v1192_v48 = vmul.f32 1.442695, %v1115_v58  ;;  %v1262_v58 = vmul.f32 1.442695, %v1150_v1 }
 0x2d5   : > { %v1303_v63 = vadd.f32 %v2738_v22, %v1302_v53 }
 0x2d6   : > { %2011 = vpow2.f32 %v1250_v49  ;;  %v1200_v49 = vmul.f32 1.442695, %v1119_v59  ;;  %v1158_v59 = vsub.f32 %v3335_v9, %v2649_v41 }
 0x2d7   : > { %v1304_v54 = vadd.f32 %v2745_v57, %v1303_v63  ;;  %v1152_v63 = vsub.f32 %v3329_v3, %v2649_v41  ;;  %2013 = vpow2.f32 %v1188_v0  ;;  %v1204_v3 = vmul.f32 1.442695, %v1121_v36 }
 0x2d8   : > { %2015 = vpow2.f32 %v1254_v6  ;;  %v1125_v6 = vsub.f32 %v2506_v11, %v2698_v61 }
 0x2d9   : > { %v1305_v53 = vadd.f32 %v2752_v28, %v1304_v54  ;;  %v1154_v54 = vsub.f32 %v3330_v5, %v2649_v41  ;;  %2017 = vpow2.f32 %v1192_v48  ;;  %v1266_v0 = vmul.f32 1.442695, %v1152_v63 }
 0x2da   : > { %2019 = vpow2.f32 %v1258_v10  ;;  %v1127_v10 = vsub.f32 %v2510_v13, %v2698_v61 }
 0x2db   : > { %v1306_v51 = vadd.f32 %v2759_v56, %v1305_v53  ;;  %v2782_v53 = vpop.eup %1993  ;;  %2021 = vpow2.f32 %v1196_v60  ;;  %v1270_v48 = vmul.f32 1.442695, %v1154_v54  ;;  %v3337_v60 = vld [vmem:[#allocation22_spill] sm:$0xff]  ;;  %v1129_v54 = vsub.f32 %v2514_v15, %v2698_v61 }
 0x2dc   : > { %2023 = vpow2.f32 %v1262_v58  ;;  %v1160_v7 = vsub.f32 %v3337_v60, %v2649_v41  ;;  %v1274_v58 = vmul.f32 1.442695, %v1156_v32  ;;  %v1278_v60 = vmul.f32 1.442695, %v1158_v59 }
 0x2dd   : > { %v1307_v44 = vadd.f32 %v2766_v40, %v1306_v51  ;;  %v2786_v51 = vpop.eup %1995  ;;  %2025 = vpow2.f32 %v1200_v49  ;;  %v1212_v49 = vmul.f32 1.442695, %v1125_v6  ;;  %v1131_v32 = vsub.f32 %v2518_v17, %v2698_v61 }
 0x2de   : > { %3333 = vst [vmem:[#allocation13_spill] sm:$0xff] %v2786_v51  ;;  %2027 = vpow2.f32 %v1266_v0  ;;  %v1133_v59 = vsub.f32 %v2522_v19, %v2698_v61 }
 0x2df   : > { %v1308_v62 = vadd.f32 %v2773_v52, %v1307_v44  ;;  %v2791_v44 = vpop.eup %1997  ;;  %2029 = vpow2.f32 %v1204_v3  ;;  %v1224_v19 = vmul.f32 1.442695, %v1131_v32  ;;  %v1139_v32 = vsub.f32 %v2534_v25, %v2698_v61 }
 0x2e0   : > { %3334 = vst [vmem:[#allocation14_spill] sm:$0xff] %v2791_v44  ;;  %v2797_v63 = vpop.eup %1999  ;;  %v1331_v11 = vadd.f32 %v2791_v44, %v2786_v51  ;;  %2031 = vpow2.f32 %v1270_v48 }
 0x2e1   : > { %v1309_v1 = vadd.f32 %v2777_v14, %v1308_v62  ;;  %v1208_v62 = vmul.f32 1.442695, %v1123_v16  ;;  %v2802_v36 = vpop.eup %2001  ;;  %v1162_v14 = vsub.f32 %v2613_v30, %v2649_v41  ;;  %v1282_v30 = vmul.f32 1.442695, %v1160_v7 }
 0x2e2   : > { %3336 = vst [vmem:[#allocation8_spill] sm:$0xff] %v2802_v36  ;;  %v2808_v13 = vpop.eup %2003  ;;  %v1332_v16 = vadd.f32 %v2802_v36, %v1331_v11  ;;  %v1164_v11 = vsub.f32 %v2625_v43, %v2649_v41  ;;  %v1135_v43 = vsub.f32 %v2526_v21, %v2698_v61  ;;  %v1228_v21 = vmul.f32 1.442695, %v1133_v59 }
 0x2e3   : > { %v1310_v5 = vadd.f32 %v2782_v53, %v1309_v1  ;;  %v2812_v1 = vpop.eup %2005  ;;  %2033 = vpow2.f32 %v1208_v62  ;;  %v1141_v59 = vsub.f32 %v2538_v27, %v2698_v61 }
 0x2e4   : > { %3338 = vst [vmem:[#allocation15_spill] sm:$0xff] %v2812_v1  ;;  %v2818_v0 = vpop.eup %2007  ;;  %v1333_v6 = vadd.f32 %v2812_v1, %v1332_v16  ;;  %2035 = vpow2.f32 %v1274_v58  ;;  %v1286_v16 = vmul.f32 1.442695, %v1162_v14 }
 0x2e5   : > { %v1311_v9 = vadd.f32 %v2797_v63, %v1310_v5  ;;  %v1216_v5 = vmul.f32 1.442695, %v1127_v10  ;;  %v2822_v3 = vpop.eup %2009  ;;  %2037 = vpow2.f32 %v1212_v49  ;;  %v1137_v49 = vsub.f32 %v2530_v23, %v2698_v61 }
 0x2e6   : > { %v2828_v48 = vpop.eup %2011  ;;  %v1334_v10 = vadd.f32 %v2822_v3, %v1333_v6  ;;  %2039 = vpow2.f32 %v1278_v60  ;;  %v1232_v23 = vmul.f32 1.442695, %v1135_v43  ;;  %v1143_v43 = vsub.f32 %v2542_v29, %v2698_v61 }
 0x2e7   : > { %v1312_v15 = vadd.f32 %v2808_v13, %v1311_v9  ;;  %v1220_v9 = vmul.f32 1.442695, %v1129_v54  ;;  %v2832_v62 = vpop.eup %2013  ;;  %2041 = vpow2.f32 %v1216_v5  ;;  %v1290_v54 = vmul.f32 1.442695, %v1164_v11 }
 0x2e8   : > { %v2836_v41 = vpop.eup %2015  ;;  %v1335_v58 = vadd.f32 %v2832_v62, %v1334_v10  ;;  %2043 = vpow2.f32 %v1282_v30  ;;  %v1236_v25 = vmul.f32 1.442695, %v1137_v49  ;;  %v1145_v49 = vsub.f32 %v2546_v31, %v2698_v61 }
 0x2e9   : > { %v1313_v17 = vadd.f32 %v2818_v0, %v1312_v15  ;;  %v2840_v15 = vpop.eup %2017  ;;  %2045 = vpow2.f32 %v1220_v9 }
 0x2ea   : > { %v2844_v60 = vpop.eup %2019  ;;  %v1336_v6 = vadd.f32 %v2840_v15, %v1335_v58  ;;  %2047 = vpow2.f32 %v1286_v16 }
 0x2eb   : > { %v1314_v7 = vadd.f32 %v2828_v48, %v1313_v17  ;;  %v2848_v17 = vpop.eup %2021  ;;  %2049 = vpow2.f32 %v1224_v19 }
 0x2ec   : > { %v2852_v5 = vpop.eup %2023  ;;  %v1337_v30 = vadd.f32 %v2848_v17, %v1336_v6  ;;  %2051 = vpow2.f32 %v1290_v54 }
 0x2ed   : > { %v1315_v14 = vadd.f32 %v2836_v41, %v1314_v7  ;;  %v2856_v10 = vpop.eup %2025  ;;  %2053 = vpow2.f32 %v1228_v21 }
 0x2ee   : > { %v2860_v9 = vpop.eup %2027  ;;  %v1338_v7 = vadd.f32 %v2856_v10, %v1337_v30  ;;  %2055 = vpow2.f32 %v1232_v23  ;;  %v1244_v30 = vmul.f32 1.442695, %v1141_v59  ;;  %v1149_v59 = vsub.f32 %v2554_v35, %v2698_v61 }
 0x2ef   : > { %v1316_v11 = vadd.f32 %v2844_v60, %v1315_v14  ;;  %v2864_v58 = vpop.eup %2029  ;;  %v1240_v14 = vmul.f32 1.442695, %v1139_v32  ;;  %2057 = vpow2.f32 %v1236_v25  ;;  %v1147_v32 = vsub.f32 %v2550_v33, %v2698_v61 }
 0x2f0   : > { %v2868_v19 = vpop.eup %2031  ;;  %v1339_v27 = vadd.f32 %v2864_v58, %v1338_v7  ;;  %v1248_v7 = vmul.f32 1.442695, %v1143_v43  ;;  %v1151_v43 = vsub.f32 %v2562_v39, %v2698_v61 }
 0x2f1   : > { %v1317_v16 = vadd.f32 %v2852_v5, %v1316_v11  ;;  %v2872_v6 = vpop.eup %2033  ;;  %2059 = vpow2.f32 %v1240_v14 }
 0x2f2   : > { %v2876_v21 = vpop.eup %2035  ;;  %v1340_v29 = vadd.f32 %v2872_v6, %v1339_v27  ;;  %2061 = vpow2.f32 %v1244_v30  ;;  %v1252_v27 = vmul.f32 1.442695, %v1145_v49  ;;  %v1153_v49 = vsub.f32 %v2570_v47, %v2698_v61 }
 0x2f3   : > { %v1318_v54 = vadd.f32 %v2860_v9, %v1317_v16  ;;  %v2880_v2 = vpop.eup %2037  ;;  %2063 = vpow2.f32 %v1248_v7 }
 0x2f4   : > { %v2884_v23 = vpop.eup %2039  ;;  %v1341_v31 = vadd.f32 %v2880_v2, %v1340_v29  ;;  %v1256_v29 = vmul.f32 1.442695, %v1147_v32  ;;  %2065 = vpow2.f32 %v1252_v27  ;;  %v1155_v32 = vsub.f32 %v2578_v42, %v2698_v61 }
 0x2f5   : > { %v1319_v11 = vadd.f32 %v2868_v19, %v1318_v54  ;;  %v2888_v51 = vpop.eup %2041  ;;  %v1159_v42 = vsub.f32 %v2594_v12, %v2698_v61  ;;  %v1163_v12 = vsub.f32 %v2619_v34, %v2698_v61 }
 0x2f6   : > { %v2892_v25 = vpop.eup %2043  ;;  %v1342_v33 = vadd.f32 %v2888_v51, %v1341_v31  ;;  %v1260_v31 = vmul.f32 1.442695, %v1149_v59  ;;  %2067 = vpow2.f32 %v1256_v29  ;;  %v1268_v59 = vmul.f32 1.442695, %v1153_v49 }
 0x2f7   : > { %v1320_v16 = vadd.f32 %v2876_v21, %v1319_v11  ;;  %v2896_v38 = vpop.eup %2045  ;;  %v1288_v34 = vmul.f32 1.442695, %v1163_v12 }
 0x2f8   : > { %v2900_v14 = vpop.eup %2047  ;;  %v1343_v35 = vadd.f32 %v2896_v38, %v1342_v33  ;;  %2069 = vpow2.f32 %v1260_v31 }
 0x2f9   : > { %v1321_v54 = vadd.f32 %v2884_v23, %v1320_v16  ;;  %v2904_v44 = vpop.eup %2049 }
 0x2fa   : > { %v2908_v30 = vpop.eup %2051  ;;  %v1344_v39 = vadd.f32 %v2904_v44, %v1343_v35 }
 0x2fb   : > { %v1322_v11 = vadd.f32 %v2892_v25, %v1321_v54  ;;  %v2912_v55 = vpop.eup %2053  ;;  %v1264_v54 = vmul.f32 1.442695, %v1151_v43  ;;  %v1272_v43 = vmul.f32 1.442695, %v1155_v32  ;;  %v1280_v32 = vmul.f32 1.442695, %v1159_v42 }
 0x2fc   : > { %v1345_v33 = vadd.f32 %v2912_v55, %v1344_v39  ;;  %v2918_v47 = vpop.eup %2055 }
 0x2fd   : > { %v1323_v16 = vadd.f32 %v2900_v14, %v1322_v11  ;;  %3339 = vst [vmem:[#allocation16_spill] sm:$0xff] %v2918_v47  ;;  %v1157_v11 = vsub.f32 %v2586_v4, %v2698_v61  ;;  %v2923_v36 = vpop.eup %2057  ;;  %2071 = vpow2.f32 %v1264_v54  ;;  %v1161_v4 = vsub.f32 %v2607_v26, %v2698_v61 }
 0x2fe   : > { %v1346_v35 = vadd.f32 %v2918_v47, %v1345_v33  ;;  %v2928_v39 = vpop.eup %2059  ;;  %2073 = vpow2.f32 %v1268_v59  ;;  %v1165_v26 = vsub.f32 %v2645_v50, %v2698_v61 }
 0x2ff   : > { %v1324_v7 = vadd.f32 %v2908_v30, %v1323_v16  ;;  %v1276_v49 = vmul.f32 1.442695, %v1157_v11  ;;  %v2933_v33 = vpop.eup %2061  ;;  %2075 = vpow2.f32 %v1272_v43 }
 0x300   : > { %v1347_v29 = vadd.f32 %v2923_v36, %v1346_v35  ;;  %v1284_v35 = vmul.f32 1.442695, %v1161_v4 }
 0x301   : > { %v1325_v27 = vrot.slane %v1324_v7, 4  ;;  %2077 = vpow2.f32 %v1276_v49 }
 0x302   : > { %v1348_v31 = vadd.f32 %v2928_v39, %v1347_v29  ;;  %2079 = vpow2.f32 %v1280_v32 }
 0x303   : > { %v1326_v16 = vadd.f32 %v1325_v27, %v1324_v7  ;;  %v2938_v27 = vpop.eup %2063  ;;  %2081 = vpow2.f32 %v1284_v35 }
 0x304   : > { %v1349_v54 = vadd.f32 %v2933_v33, %v1348_v31  ;;  %v2943_v59 = vpop.eup %2065 }
 0x305   : > { %v1327_v8 = vrot.slane %v1326_v16, 2  ;;  %v2946_v42 = vpop.eup %2067 }
 0x306   : > { %v1350_v11 = vadd.f32 %v2938_v27, %v1349_v54  ;;  %v2070_v4 = vpop.eup %2069 }
 0x307   : > { %v1328_v7 = vadd.f32 %v1327_v8, %v1326_v16  ;;  %v1292_v16 = vmul.f32 1.442695, %v1165_v26 }
 0x308   : > { %v1351_v8 = vadd.f32 %v2943_v59, %v1350_v11 }
 0x309   : > { %v1329_v47 = vrot.slane %v1328_v7, 1 }
 0x30a   : > { %v1352_v43 = vadd.f32 %v2946_v42, %v1351_v8  ;;  %v2072_v61 = vpop.eup %2071 }
 0x30b   : > { %v1330_v29 = vadd.f32 %v1329_v47, %v1328_v7  ;;  %v2074_v31 = vpop.eup %2073 }
 0x30c   : > { %v1353_v50 = vadd.f32 %v2070_v4, %v1352_v43  ;;  %v2076_v47 = vpop.eup %2075 }
 0x30d   : > { %2083 = vrcp.f32 %v1330_v29 }
 0x30e   : > { %2085 = vpow2.f32 %v1288_v34  ;;  %v1354_v49 = vadd.f32 %v2072_v61, %v1353_v50  ;;  %v2078_v12 = vpop.eup %2077 }
 0x30f   : > { %2087 = vpow2.f32 %v1292_v16  ;;  %v2080_v11 = vpop.eup %2079 }
 0x310   : > { %v1355_v54 = vadd.f32 %v2074_v31, %v1354_v49  ;;  %v2082_v1 = vpop.eup %2081 }
 0x312   : > { %v1356_v7 = vadd.f32 %v2076_v47, %v1355_v54 }
 0x314   : > { %v1357_v32 = vadd.f32 %v2078_v12, %v1356_v7 }
 0x316   : > { %v1358_v24 = vadd.f32 %v2080_v11, %v1357_v32 }
 0x318   : > { %v1359_v26 = vadd.f32 %v2082_v1, %v1358_v24 }
 0x31a   : > { %v2949_v35 = vpop.eup %2083 }
 0x31b   : > { %v1400_v29 = vmul.f32 %v2949_v35, %v2773_v52  ;;  %v1398_v34 = vmul.f32 %v2949_v35, %v2766_v40  ;;  %v1396_v8 = vmul.f32 %v2949_v35, %v2759_v56  ;;  %v2086_v16 = vpop.eup %2085  ;;  %v2959_v54 = vmul.f32 %v2949_v35, %v2908_v30 }
 0x31c   : > { %v1360_v43 = vadd.f32 %v2086_v16, %v1359_v26  ;;  %v2088_v50 = vpop.eup %2087  ;;  %v2963_v24 = vmul.f32 %v2949_v35, %v2900_v14  ;;  %v2967_v52 = vmul.f32 %v2949_v35, %v2892_v25  ;;  %v2971_v40 = vmul.f32 %v2949_v35, %v2884_v23 }
 0x31d   : > { %v2975_v56 = vmul.f32 %v2949_v35, %v2876_v21  ;;  %v2979_v30 = vmul.f32 %v2949_v35, %v2868_v19  ;;  %v2983_v14 = vmul.f32 %v2949_v35, %v2860_v9  ;;  %v2987_v25 = vmul.f32 %v2949_v35, %v2852_v5 }
 0x31e   : > { %v1361_v49 = vadd.f32 %v2088_v50, %v1360_v43  ;;  %v2991_v23 = vmul.f32 %v2949_v35, %v2844_v60  ;;  %v2995_v21 = vmul.f32 %v2949_v35, %v2836_v41  ;;  %v2999_v19 = vmul.f32 %v2949_v35, %v2828_v48 }
 0x31f   : > { %v3003_v9 = vmul.f32 %v2949_v35, %v2818_v0  ;;  %v3007_v5 = vmul.f32 %v2949_v35, %v2808_v13  ;;  %v3011_v60 = vmul.f32 %v2949_v35, %v2797_v63  ;;  %v3015_v41 = vmul.f32 %v2949_v35, %v2782_v53 }
 0x320   : > { %v1362_v7 = vrot.slane %v1361_v49, 4  ;;  %3340 = vst [vmem:[#allocation17_spill] sm:$0xff] %v2999_v19 }
 0x322   : > { %v1363_v32 = vadd.f32 %v1362_v7, %v1361_v49 }
 0x324   : > { %v1364_v26 = vrot.slane %v1363_v32, 2 }
 0x326   : > { %v1365_v48 = vadd.f32 %v1364_v26, %v1363_v32  ;;  %v3342_v26 = vld [vmem:[#allocation15_spill] sm:$0xff] }
 0x328   : > { %v1366_v43 = vrot.slane %v1365_v48, 1 }
 0x32a   : > { %v1367_v19 = vadd.f32 %v1366_v43, %v1365_v48  ;;  %v3344_v43 = vld [vmem:[#allocation8_spill] sm:$0xff] }
 0x32c   : > { %2089 = vrcp.f32 %v1367_v19 }
 0x339   : > { %v3017_v0 = vpop.eup %2089 }
 0x33a   : > { %v1401_v49 = vmul.f32 %v3017_v0, %v2912_v55  ;;  %v1399_v13 = vmul.f32 %v3017_v0, %v2904_v44  ;;  %v1397_v63 = vmul.f32 %v3017_v0, %v2896_v38  ;;  %v3026_v53 = vmul.f32 %v3017_v0, %v2088_v50 }
 0x33b   : > { %v3029_v7 = vmul.f32 %v3017_v0, %v2086_v16  ;;  %v3032_v19 = vmul.f32 %v3017_v0, %v2082_v1  ;;  %v3035_v55 = vmul.f32 %v3017_v0, %v2080_v11  ;;  %v3038_v44 = vmul.f32 %v3017_v0, %v2078_v12 }
 0x33c   : > { %1434 = vmatprep.subr.mxu0 %v1401_v49  ;;  %v3041_v38 = vmul.f32 %v3017_v0, %v2076_v47  ;;  %v3047_v50 = vmul.f32 %v3017_v0, %v2072_v61  ;;  %v3050_v16 = vmul.f32 %v3017_v0, %v2070_v4  ;;  %v3054_v1 = vmul.f32 %v3017_v0, %v2946_v42 }
 0x33d   : > { %1435 = vmatpush1.xpose.msra.mxu0 %v1400_v29  ;;  %v3044_v29 = vmul.f32 %v3017_v0, %v2074_v31  ;;  %v3058_v12 = vmul.f32 %v3017_v0, %v2943_v59  ;;  %v3062_v47 = vmul.f32 %v3017_v0, %v2938_v27  ;;  %v3066_v61 = vmul.f32 %v3017_v0, %v2933_v33 }
 0x33e   : > { %1436 = vmatprep.subr.mxu0 %v1399_v13  ;;  %v3070_v4 = vmul.f32 %v3017_v0, %v2928_v39  ;;  %v3074_v42 = vmul.f32 %v3017_v0, %v2923_v36  ;;  %v1395_v59 = vmul.f32 %v3017_v0, %v2888_v51  ;;  %v1394_v27 = vmul.f32 %v2949_v35, %v2752_v28  ;;  %v1531_v39 = vld [vmem:[%s3263_s3] sm:$0xff]  ;;  %v1532_v36 = vld [vmem:[%s3263_s3 + $0x8] sm:$0xff] }
 0x33f   : > { %v1393_v33 = vmul.f32 %v3017_v0, %v2880_v2  ;;  %1535 = vxpose.xlu0.b32.start [1/4] (short) (narrow) %v1531_v39, 32  ;;  %v1392_v51 = vmul.f32 %v2949_v35, %v2745_v57  ;;  %v1391_v28 = vmul.f32 %v3017_v0, %v2872_v6  ;;  %v1533_v2 = vld [vmem:[%s3263_s3 + $0x10] sm:$0xff]  ;;  %v1390_v31 = vmul.f32 %v2949_v35, %v2738_v22  ;;  %v1534_v57 = vld [vmem:[%s3263_s3 + $0x18] sm:$0xff]  ;;  %v3346_v13 = vld [vmem:[#allocation14_spill] sm:$0xff] }
 0x340   : > { %v1389_v11 = vmul.f32 %v3017_v0, %v2864_v58  ;;  %v1388_v6 = vmul.f32 %v2949_v35, %v2731_v37  ;;  %v1386_v22 = vmul.f32 %v2949_v35, %v2724_v46  ;;  %v1385_v58 = vmul.f32 %v3017_v0, %v2848_v17 }
 0x341   : > { %1437 = vmatpush1.xpose.msra.mxu0 %v1398_v34  ;;  %v1387_v34 = vmul.f32 %v3017_v0, %v2856_v10  ;;  %v1383_v37 = vmul.f32 %v3017_v0, %v2840_v15  ;;  %v1382_v10 = vmul.f32 %v2949_v35, %v2710_v18  ;;  %v1381_v32 = vmul.f32 %v3017_v0, %v2832_v62  ;;  %v3343_v18 = vld [vmem:[#allocation23_spill] sm:$0xff] }
 0x342   : > { %1438 = vmatprep.subr.mxu0 %v1397_v63  ;;  %v1380_v46 = vmul.f32 %v2949_v35, %v2703_v45  ;;  %v1379_v17 = vmul.f32 %v3017_v0, %v2822_v3  ;;  %v1377_v48 = vmul.f32 %v3017_v0, %v3342_v26  ;;  %v1376_v62 = vmul.f32 %v2949_v35, %v3343_v18  ;;  %v3345_v45 = vld [vmem:[#allocation11_spill] sm:$0xff]  ;;  %v2094_v18 = vld [vmem:[%s2283_s17 + $0x18] sm:$0xff] }
 0x343   : > { %1536 = vxpose.xlu0.b32.cont [2/4] (short) (narrow) %v1532_v36, 32  ;;  %v1375_v49 = vmul.f32 %v3017_v0, %v3344_v43  ;;  %v1374_v3 = vmul.f32 %v2949_v35, %v3345_v45  ;;  %v1373_v63 = vmul.f32 %v3017_v0, %v3346_v13  ;;  %v3349_v36 = vld [vmem:[#allocation9_spill] sm:$0xff]  ;;  %v2095_v45 = vld [vmem:[%s2283_s17 + $0x20] sm:$0xff] }
 0x345   : > { %1439 = vmatpush1.xpose.msra.mxu0 %v1396_v8  ;;  %v1384_v8 = vmul.f32 %v2949_v35, %v2717_v20  ;;  %v3341_v20 = vld [vmem:[#allocation24_spill] sm:$0xff] }
 0x346   : > { %1440 = vmatprep.subr.mxu0 %v1395_v59  ;;  %v1378_v15 = vmul.f32 %v2949_v35, %v3341_v20  ;;  %v3347_v59 = vld [vmem:[#allocation10_spill] sm:$0xff]  ;;  %v2093_v20 = vld [vmem:[%s2283_s17 + $0x10] sm:$0xff] }
 0x347   : > { %1537 = vxpose.xlu0.b32.cont [3/4] (short) (narrow) %v1533_v2, 32 }
 0x349   : > { %1441 = vmatpush1.xpose.msra.mxu0 %v1394_v27  ;;  %v1372_v27 = vmul.f32 %v2949_v35, %v3347_v59 }
 0x34a   : > { %1442 = vmatprep.subr.mxu0 %v1393_v33  ;;  %v3348_v33 = vld [vmem:[#allocation13_spill] sm:$0xff] }
 0x34b   : > { %1538 = vxpose.xlu0.b32.end [4/4] (short) (narrow) %v1534_v57, 32  ;;  %v1371_v39 = vmul.f32 %v3017_v0, %v3348_v33 }
 0x34d   : > { %1443 = vmatpush1.xpose.msra.mxu0 %v1392_v51  ;;  %v1370_v51 = vmul.f32 %v2949_v35, %v3349_v36 }
 0x34e   : > { %1444 = vmatprep.subr.mxu0 %v1391_v28 }
 0x351   : > { %1445 = vmatpush1.xpose.msra.mxu0 %v1390_v31  ;;  %v3355_v31 = vmov 0.0  }
 0x352   : > { %1446 = vmatprep.subr.mxu0 %v1389_v11 }
 0x355   : > { %1447 = vmatpush1.xpose.msra.mxu0 %v1388_v6 }
 0x356   : > { %1448 = vmatprep.subr.mxu0 %v1387_v34 }
 0x359   : > { %1449 = vmatpush1.xpose.msra.mxu0 %v1386_v22  ;;  %v2091_v22 = vld [vmem:[%s2283_s17] sm:$0xff] }
 0x35a   : > { %1450 = vmatprep.subr.mxu0 %v1385_v58 }
 0x35d   : > { %1451 = vmatpush1.xpose.msra.mxu0 %v1384_v8 }
 0x35e   : > { %1452 = vmatprep.subr.mxu0 %v1383_v37  ;;  %v2092_v37 = vld [vmem:[%s2283_s17 + $0x8] sm:$0xff] }
 0x361   : > { %1453 = vmatpush1.xpose.msra.mxu0 %v1382_v10 }
 0x362   : > { %1454 = vmatprep.subr.mxu0 %v1381_v32 }
 0x365   : > { %1455 = vmatpush1.xpose.msra.mxu0 %v1380_v46 }
 0x366   : > { %1456 = vmatprep.subr.mxu0 %v1379_v17 }
 0x369   : > { %1457 = vmatpush1.xpose.msra.mxu0 %v1378_v15 }
 0x36a   : > { %1458 = vmatprep.subr.mxu0 %v1377_v48 }
 0x36d   : > { %1459 = vmatpush1.xpose.msra.mxu0 %v1376_v62 }
 0x36e   : > { %1460 = vmatprep.subr.mxu0 %v1375_v49 }
 0x371   : > { %1461 = vmatpush1.xpose.msra.mxu0 %v1374_v3 }
 0x372   : > { %1462 = vmatprep.subr.mxu0 %v1373_v63 }
 0x375   : > { %1463 = vmatpush1.xpose.msra.mxu0 %v1372_v27  ;;  %v2096_v27 = vld [vmem:[%s2283_s17 + $0x28] sm:$0xff] }
 0x376   : > { %1464 = vmatprep.subr.mxu0 %v1371_v39 }
 0x379   : > { %1465 = vmatpush1.xpose.msra.mxu0 %v1370_v51  ;;  %v2097_v51 = vld [vmem:[%s2283_s17 + $0x30] sm:$0xff] }
 0x37a   : > { %1466 = vmatprep.subr.mxu0 %v3026_v53 }
 0x37d   : > { %1467 = vmatpush2.xpose.msra.mxu0 %v2959_v54  ;;  %v3350_v54 = vld [vmem:[#allocation17_spill] sm:$0xff] }
 0x37e   : > { %1468 = vmatprep.subr.mxu0 %v3029_v7 }
 0x381   : > { %1469 = vmatpush2.xpose.msra.mxu0 %v2963_v24  ;;  %v594_v24 = vpop.f32.mrf.mxu0 }
 0x382   : > { %1470 = vmatprep.subr.mxu0 %v3032_v19  ;;  %v430_v19 = vpop.permute.xlu0 %429 }
 0x385   : > { %1471 = vmatpush2.xpose.msra.mxu0 %v2967_v52  ;;  %v596_v52 = vpop.f32.mrf.mxu0 }
 0x386   : > { %1472 = vmatprep.subr.mxu0 %v3035_v55 }
 0x389   : > { %1473 = vmatpush2.xpose.msra.mxu0 %v2971_v40  ;;  %v600_v40 = vpop.f32.mrf.mxu0 }
 0x38a   : > { %1474 = vmatprep.subr.mxu0 %v3038_v44 }
 0x38d   : > { %1475 = vmatpush2.xpose.msra.mxu0 %v2975_v56  ;;  %v3351_v56 = vld [vmem:[#allocation16_spill] sm:$0xff] }
 0x38e   : > { %1476 = vmatprep.subr.mxu0 %v3041_v38 }
 0x391   : > { %1477 = vmatpush2.xpose.msra.mxu0 %v2979_v30  ;;  %v1403_v30 = vmul.f32 %v3017_v0, %v3351_v56 }
 0x392   : > { %1478 = vmatprep.subr.mxu0 %v3044_v29 }
 0x395   : > { %1479 = vmatpush2.xpose.msra.mxu0 %v2983_v14  ;;  %v3352_v14 = vld [vmem:[#allocation12_spill] sm:$0xff] }
 0x396   : > { %1480 = vmatprep.subr.mxu0 %v3047_v50 }
 0x399   : > { %1481 = vmatpush2.xpose.msra.mxu0 %v2987_v25  ;;  %v1402_v25 = vmul.f32 %v2949_v35, %v3352_v14 }
 0x39a   : > { %1482 = vmatprep.subr.mxu0 %v3050_v16 }
 0x39d   : > { %1483 = vmatpush2.xpose.msra.mxu0 %v2991_v23  ;;  %v602_v23 = vpop.f32.mrf.mxu0 }
 0x39e   : > { %1484 = vmatprep.subr.mxu0 %v3054_v1  ;;  %v603_v44 = vadd.f32 %v602_v23, %v430_v19 }
 0x3a1   : > { %1485 = vmatpush2.xpose.msra.mxu0 %v2995_v21  ;;  %v425_v21 = vpop.permute.xlu1 %424 }
 0x3a2   : > { %1486 = vmatprep.subr.mxu0 %v3058_v12  ;;  %v597_v7 = vadd.f32 %v596_v52, %v425_v21  ;;  %v595_v55 = vadd.f32 %v594_v24, %v425_v21 }
 0x3a5   : > { %1487 = vmatpush2.xpose.msra.mxu0 %v3350_v54  ;;  %v435_v38 = vpop.permute.xlu1 %434 }
 0x3a6   : > { %1488 = vmatprep.subr.mxu0 %v3062_v47 }
 0x3a9   : > { %1489 = vmatpush2.xpose.msra.mxu0 %v3003_v9  ;;  %v3353_v9 = vld [vmem:[#allocation7_spill] sm:$0xff]  ;;  %v320_v6 = vpop.permute.xlu1 %319 }
 0x3aa   : > { %1490 = vmatprep.subr.mxu0 %v3066_v61  ;;  %v337_v58 = vadd.f32 %v2091_v22, %v320_v6  ;;  %v338_v10 = vadd.f32 %v2092_v37, %v320_v6 }
 0x3ad   : > { %1491 = vmatpush2.xpose.msra.mxu0 %v3007_v5  ;;  %v3354_v5 = vld [vmem:[#allocation6_spill] sm:$0xff]  ;;  %v325_v34 = vpop.permute.xlu1 %324 }
 0x3ae   : > { %1492 = vmatprep.subr.mxu0 %v3070_v4  ;;  %v589_v53 = vadd.f32 %v3354_v5, %v3353_v9  ;;  %v339_v15 = vadd.f32 %v2093_v20, %v325_v34  ;;  %v340_v62 = vadd.f32 %v2094_v18, %v325_v34 }
 0x3b1   : > { %1493 = vmatpush2.xpose.msra.mxu0 %v3011_v60  ;;  %v606_v60 = vpop.f32.mrf.mxu0  ;;  %v330_v46 = vpop.permute.xlu1 %329 }
 0x3b2   : > { %1494 = vmatprep.subr.mxu0 %v3074_v42  ;;  %v607_v35 = vadd.f32 %v606_v60, %v435_v38  ;;  %v341_v3 = vadd.f32 %v2095_v45, %v330_v46  ;;  %v342_v33 = vadd.f32 %v2096_v27, %v330_v46 }
 0x3b3   : > { %v608_v0 = vpop.f32.mrf.mxu0 }
 0x3b4   : > { %v609_v29 = vadd.f32 %v608_v0, %v435_v38 }
 0x3b5   : > { %1495 = vmatpush2.xpose.msra.mxu0 %v3015_v41  ;;  %v601_v41 = vadd.f32 %v600_v40, %v430_v19  ;;  %v335_v63 = vpop.permute.xlu1 %334  ;;  %v2098_v40 = vld [vmem:[%s2283_s17 + $0x38] sm:$0xff]  ;;  %s2099_s17 = scalar_lea.vmem %s3209_s9, 1024 }
 0x3b6   : > { %1496 = vmatprep.subr.mxu0 %v1403_v30  ;;  %v343_v54 = vadd.f32 %v2097_v51, %v335_v63  ;;  %v344_v56 = vadd.f32 %v2098_v40, %v335_v63  ;;  %p2100_p12 = scmp.ne.s32.totalorder %s3209_s9, %s2099_s17  ;;  %p2107_p2 = scmp.lt.s32.totalorder %s2105_s15, %s2099_s17 }
 0x3b8   : > { %p2101_p13 = pnand %p2100_p12, %p2252_p4  ;;  %p2108_p3 = por %p2107_p2, %p2106_p1 }
 0x3b9   : > { %1497 = vmatpush2.xpose.msra.mxu0 %v1402_v25 }
 0x3ba   : > { %p2102_p0 = pneg %p2101_p13 }
 0x3bb   : > { %v1551_v28 = vpop.trf.xlu0 }
 0x3bc   : > { %1499 = vmatmul.mubr.f32.vlgmr.msra.gmra.mxu0 %v589_v53  ;;  %p2109_p5 = pnand %p2108_p3, %p2102_p0 }
 0x3bd   : > { %1504 = vmatprep.mubr.f32.mxu0 %v597_v7 }
 0x3bf   : > { %v1552_v2 = vpop.trf.xlu0 }
 0x3c0   : > { %1505 = vmatmul.mubr.f32.gmra.mxu0 %v595_v55 }
 0x3c1   : > { %1510 = vmatprep.mubr.f32.mxu0 %v603_v44 }
 0x3c3   : > { %v1553_v11 = vpop.trf.xlu0 }
 0x3c4   : > { %1511 = vmatmul.mubr.f32.gmra.mxu0 %v601_v41 }
 0x3c5   : > { %1516 = vmatprep.mubr.f32.mxu0 %v609_v29 }
 0x3c7   : > { %v1554_v57 = vpop.trf.xlu0 }
 0x3c8   : > { %1517 = vmatmul.mubr.f32.gmra.mxu0 %v607_v35 }
 0x47c   : > { %v1500_v50 = vpop.f32.mrf.mxu0 }
 0x47e   : > { %v1502_v16 = vpop.f32.mrf.mxu0 }
 0x480   : > { %v1506_v1 = vpop.f32.mrf.mxu0 }
 0x482   : > { %v1508_v12 = vpop.f32.mrf.mxu0 }
 0x484   : > { %v1512_v47 = vpop.f32.mrf.mxu0 }
 0x486   : > { %v1514_v61 = vpop.f32.mrf.mxu0 }
 0x488   : > { %v1518_v4 = vpop.f32.mrf.mxu0 }
 0x48a   : > { %v1520_v42 = vpop.f32.mrf.mxu0 }
 0x48b   : > { %1603 = vmatprep.subr.mxu1 %v1520_v42 }
 0x48c   : > { %1604 = vmatpush1.msra.mxu1 %v1518_v4 }
 0x48d   : > { %1605 = vmatprep.subr.mxu1 %v1514_v61 }
 0x48e   : > { %1606 = vmatpush1.msra.mxu1 %v1512_v47 }
 0x48f   : > { %1607 = vmatprep.subr.mxu1 %v1508_v12 }
 0x490   : > { %1608 = vmatpush1.msra.mxu1 %v1506_v1 }
 0x491   : > { %1609 = vmatprep.subr.mxu1 %v1502_v16 }
 0x492   : > { %1610 = vmatpush1.msra.mxu1 %v1500_v50 }
 0x493   : > { %1887 = vmatmul.mubr.msk.f32.vlgmr.msra.gmra.mxu1 %vm437_vm0, %v1551_v28 }
 0x494   : > { %1649 = vmatprep.mubr.f32.mxu1 %v3355_v31 }
 0x497   : > { %1888 = vmatmul.mubr.msk.f32.gmra.mxu1 %vm437_vm0, %v1552_v2 }
 0x498   : > { %1655 = vmatprep.mubr.f32.mxu1 %v3355_v31 }
 0x49b   : > { %1889 = vmatmul.mubr.msk.f32.gmra.mxu1 %vm437_vm0, %v1553_v11 }
 0x49c   : > { %1661 = vmatprep.mubr.f32.mxu1 %v3355_v31 }
 0x49f   : > { %1890 = vmatmul.mubr.msk.f32.gmra.mxu1 %vm437_vm0, %v1554_v57 }
 0x553   : > { %v1645_v8 = vpop.f32.mrf.mxu1 }
 0x554   : > { %v1668_v32 = vadd.f32 %v1645_v8, %v337_v58 }
 0x555   : > { %v1647_v17 = vpop.f32.mrf.mxu1 }
 0x556   : > { %1695 = vst [vmem:[%s3189_s7] sm:$0xff] %v1668_v32  ;;  %v1669_v26 = vadd.f32 %v1647_v17, %v338_v10 }
 0x557   : > { %v1651_v48 = vpop.f32.mrf.mxu1 }
 0x558   : > { %1696 = vst [vmem:[%s3189_s7 + $0x8] sm:$0xff] %v1669_v26  ;;  %v1670_v43 = vadd.f32 %v1651_v48, %v339_v15 }
 0x559   : > { %v1653_v49 = vpop.f32.mrf.mxu1 }
 0x55a   : > { %1697 = vst [vmem:[%s3189_s7 + $0x10] sm:$0xff] %v1670_v43  ;;  %v1671_v13 = vadd.f32 %v1653_v49, %v340_v62 }
 0x55b   : > { %v1657_v59 = vpop.f32.mrf.mxu1 }
 0x55c   : > { %1698 = vst [vmem:[%s3189_s7 + $0x18] sm:$0xff] %v1671_v13  ;;  %v1672_v39 = vadd.f32 %v1657_v59, %v341_v3 }
 0x55d   : > { %v1659_v36 = vpop.f32.mrf.mxu1 }
 0x55e   : > { %1699 = vst [vmem:[%s3189_s7 + $0x20] sm:$0xff] %v1672_v39  ;;  %v1673_v24 = vadd.f32 %v1659_v36, %v342_v33 }
 0x55f   : > { %v1663_v52 = vpop.f32.mrf.mxu1 }
 0x560   : > { %1700 = vst [vmem:[%s3189_s7 + $0x28] sm:$0xff] %v1673_v24  ;;  %v1674_v30 = vadd.f32 %v1663_v52, %v343_v54 }
 0x561   : > { %v1665_v14 = vpop.f32.mrf.mxu1 }
 0x562   : > { %1701 = vst [vmem:[%s3189_s7 + $0x30] sm:$0xff] %v1674_v30  ;;  %v1675_v25 = vadd.f32 %v1665_v14, %v344_v56 }
 0x564   : > { %1702 = vst [vmem:[%s3189_s7 + $0x38] sm:$0xff] %v1675_v25 }
 0x565   : > { %2112 = shalt.err (!%p2109_p5)
}
 0x566   : > { %s2113_s16 = scalar_lea.hbm %s3207_s12, 1024  ;;  %s2117_s27 = scalar_lea.hbm %s3265_s5, 2048 }
 0x567   : > { %p2114_p6 = scmp.ne.s32.totalorder %s3207_s12, %s2113_s16  ;;  %p2118_p10 = scmp.lt.s32.totalorder %s3207_s12, %s3265_s5 }
 0x568   : > { %p2119_p11 = scmp.lt.s32.totalorder %s2117_s27, %s2113_s16 }
 0x569   : > { %p2115_p7 = pnand %p2114_p6, %p2252_p4 }
 0x56a   : > { %p2120_p12 = por %p2119_p11, %p2118_p10 }
 0x56b   : > { %p2116_p9 = pneg %p2115_p7 }
 0x56d   : > { %p2121_p13 = pnand %p2120_p12, %p2116_p9 }
 0x56f   : > { %2124 = shalt.err (!%p2121_p13)
}
 0x570   : > { %s2180_s8 = smov 256   ;;  %s2181_s10 = smov 16  }
 0x571   : > { %1898 = dma.vmem_to_hbm [thread:$0]  (%p2252_p4), %s3209_s9, 1024, %s3207_s12, %s3215_s21, %s2180_s8, %s2180_s8, %s2181_s10  }
 0x572 PF: > { %p1904_p0 = scmp.ge.s32.totalorder %s2175_s23, 2  ;;  %s1732_s11 = sand.u32 1, %s2155_s18  }
 0x573   : > { %s1733_s17 = scalar_lea.sflag [#allocation4], %s1732_s11 }
 0x574   : > { %p1901_p1 = pnand %p1904_p0, %p2259_p8 }
 0x576   : > { %p1902_p2 = pneg %p1901_p1 }
 0x578   : > { %2150 = dma.done.wait (%p1902_p2), %s1733_s17, 1024  }
 0x579   : > { %2152 = vsyncadd (%p1902_p2), %s1733_s17, 4294966272  ;;  %s18_s23 = sadd.s32 1, %s2175_s23   ;;  %s3356_s18 = smov %s2159_s19 }
 0x57a   : > { %p15_p3 = scmp.ge.s32.totalorder %s18_s23, 4   ;;  %s3357_s19 = smov %s2163_s20 }
 0x57b   : > { %s3358_s20 = smov %s2265_s6  ;;  %s3359_s21 = smov %s2171_s22 }
 0x57c   : > { %s3360_s22 = smov %s3362_s26  ;;  %17 = sbr.rel (!%p15_p3) target bundleno = 4 (0x4), region = 92 }
 0x581   :  { %1738 = vsyncpa [#allocation4], 1 }
 0x582   :  { %1740 = vsyncpa [#allocation4 + $0x1], 1 }

</bundles_post_ra>
